<compile_context>
chip_gen: v5e
topology: v5e:2x2
jax: 0.10.0
libtpu: 0.0.40
codegen_flags: <defaults>
</compile_context>

<pallas_src>
import functools

import numpy as np
import jax
import jax.numpy as jnp
from jax import lax
from jax.experimental import pallas as pl
from jax.experimental.pallas import tpu as pltpu

_PI = float(np.pi)
_PI_2 = _PI / 2.0
_PI_4 = _PI / 4.0
_TAN_3PI_8 = 2.414213562373095
_TAN_PI_8 = 0.4142135623730951


# ----------------------------------------------------------------------------
# elementwise helpers (amp / phase epilogue)
# ----------------------------------------------------------------------------
def _fast_recip(x):
    """Approx reciprocal on the EUP + one Newton step (~f32 accuracy, cheap)."""
    r = pl.reciprocal(x, approx=True)
    return r * (2.0 - x * r)


def _atan_pos(x):
    """atan(x) for x >= 0 (Cephes float32 polynomial; divides go to the EUP)."""
    big = x > _TAN_3PI_8
    mid = (x > _TAN_PI_8) & (~big)
    inv_big = _fast_recip(jnp.maximum(x, 1e-30))
    inv_mid = _fast_recip(x + 1.0)
    xr = jnp.where(big, -inv_big, jnp.where(mid, (x - 1.0) * inv_mid, x))
    bias = jnp.where(big, _PI_2, jnp.where(mid, _PI_4, 0.0))
    z = xr * xr
    p = (((8.05374449538e-2 * z - 1.38776856032e-1) * z
          + 1.99777106478e-1) * z - 3.33329491539e-1)
    return bias + p * z * xr + xr


def _atan2(y, x):
    """torch.angle equivalent (atan2(y, x)) from Pallas-safe primitives.

    NOTE: atan2(-0.0, x<0) returns +pi (differs from numpy/torch sign of zero;
    harmless for real data).
    """
    safe_x = jnp.where(x == 0.0, 1.0, x)
    r = jnp.abs(y) * _fast_recip(jnp.maximum(jnp.abs(safe_x), 1e-30))
    r = jnp.minimum(r, 1e30)
    a = _atan_pos(r)                                   # in [0, pi/2]
    ang = jnp.where(x > 0.0, a, _PI - a)
    ang = jnp.where(x == 0.0, _PI_2, ang)
    ang = jnp.where((x == 0.0) & (y == 0.0), 0.0, ang)
    return jnp.where(y < 0.0, -ang, ang)


def _complex_matmul(ar, ai, br, bi, *, gauss, b_sum=None):
    """(ar + i*ai) @ (br + i*bi) with f32 accumulation on the MXU.

    gauss=True  -> 3 matmuls (imag = p3 - p1 - p2); only used with f32 inputs.
    gauss=False -> 4 matmuls; no cancellation in the imaginary part (bf16-safe).
    """
    dot = functools.partial(jnp.dot, preferred_element_type=jnp.float32)
    p1 = dot(ar, br)
    p2 = dot(ai, bi)
    if gauss:
        bs = b_sum if b_sum is not None else (br + bi)
        im = dot(ar + ai, bs) - p1 - p2
    else:
        im = dot(ar, bi) + dot(ai, br)
    return p1 - p2, im


# ----------------------------------------------------------------------------
# kernels
# ----------------------------------------------------------------------------
def _connector_kernel_kron(d_re_ref, d_im_ref, m_re_ref, m_im_ref,
                           k_re_ref, k_im_ref,
                           res_re_ref, res_im_ref, amp_ref, phase_ref,
                           cube_re_ref, cube_im_ref, *, scale, gauss):
    """Small-npix path: lane-dense (c_blk, npix^2) blocks, Kronecker DFT."""
    rr = d_re_ref[...] - m_re_ref[...]
    ri = d_im_ref[...] - m_im_ref[...]
    res_re_ref[...] = rr
    res_im_ref[...] = ri
    amp_ref[...] = jnp.sqrt(rr * rr + ri * ri)
    phase_ref[...] = _atan2(ri, rr)

    k_re = k_re_ref[...]
    k_im = k_im_ref[...]
    cd = k_re.dtype
    ar = rr if cd == jnp.float32 else rr.astype(cd)
    ai = ri if cd == jnp.float32 else ri.astype(cd)
    # whole 2-D inverse DFT: (c_blk, P) @ (P, P), P = npix^2 (K, N both MXU-sized)
    c_re, c_im = _complex_matmul(ar, ai, k_re, k_im, gauss=gauss)
    cube_re_ref[...] = scale * c_re          # scalar epilogue on the VPU
    cube_im_ref[...] = scale * c_im


def _connector_kernel_dft(d_re_ref, d_im_ref, m_re_ref, m_im_ref,
                          w_re_ref, w_im_ref,
                          res_re_ref, res_im_ref, amp_ref, phase_ref,
                          cube_re_ref, cube_im_ref, *, scale, gauss):
    """Large-npix path: cube = scale * (W @ R @ W), two-sided DFT matmuls."""
    rr = d_re_ref[...] - m_re_ref[...]
    ri = d_im_ref[...] - m_im_ref[...]
    res_re_ref[...] = rr
    res_im_ref[...] = ri
    amp_ref[...] = jnp.sqrt(rr * rr + ri * ri)
    phase_ref[...] = _atan2(ri, rr)

    c_blk, npix, _ = rr.shape
    w_re = w_re_ref[...]
    w_im = w_im_ref[...]
    w_sum = (w_re + w_im) if gauss else None
    cd = w_re.dtype
    cast = (lambda v: v) if cd == jnp.float32 else (lambda v: v.astype(cd))

    # right-side DFT with all channels stacked along M:  T = R @ W
    rr_f = rr.reshape(c_blk * npix, npix)    # leading-dim merge: free
    ri_f = ri.reshape(c_blk * npix, npix)
    t_re, t_im = _complex_matmul(cast(rr_f), cast(ri_f), w_re, w_im,
                                 gauss=gauss, b_sum=w_sum)

    # left-side DFT per channel.  c_blk <= 2 here (npix <= 32 uses the
    # Kronecker kernel), so this loop is at most 2 full-size matmul groups.
    for c in range(c_blk):
        tr = t_re[c * npix:(c + 1) * npix, :]
        ti = t_im[c * npix:(c + 1) * npix, :]
        q_re, q_im = _complex_matmul(w_re, w_im, cast(tr), cast(ti), gauss=gauss)
        cube_re_ref[c] = scale * q_re
        cube_im_ref[c] = scale * q_im


# ----------------------------------------------------------------------------
# host-side helpers (trace-time only)
# ----------------------------------------------------------------------------
def _chip_info():
    """(physical VMEM bytes, has >=2 TensorCores per chip)."""
    phys_vmem = 64 * 2 ** 20
    try:
        phys_vmem = int(pltpu.get_tpu_info().vmem_capacity_bytes)
    except Exception:
        pass
    kind = ""
    try:
        kind = jax.devices()[0].device_kind.lower()
    except Exception:
        pass
    multi_core = any(t in kind for t in ("v4", "v5p", "v7", "7x"))
    return phys_vmem, multi_core


def _vmem_cap(phys_vmem):
    if phys_vmem <= 64 * 2 ** 20:                       # v7x: leave headroom
        return max(32 * 2 ** 20, phys_vmem - 12 * 2 ** 20)
    return min(phys_vmem - 20 * 2 ** 20, 108 * 2 ** 20)  # v5e / v6e 128-MiB parts


def _pick_channel_block_kron(nchan, multi_core):
    """c_blk for the lane-dense path: divides nchan, second-minor-dim legal
    (multiple of 8 or the full dim), grid kept even only on dual-TC chips."""
    cap = min(nchan, 128)
    valid = [c for c in range(1, nchan + 1)
             if nchan % c == 0 and c <= cap and (c % 8 == 0 or c == nchan)]
    if not valid:
        return nchan
    if multi_core:
        even = [c for c in valid if (nchan // c) % 2 == 0]
        if even:
            return max(even)
    return max(valid)


def _pick_channel_block_dft(nchan, npix, multi_core):
    if npix >= 128:
        return 1
    c_blk = min(nchan, max(1, 128 // npix))
    while nchan % c_blk:
        c_blk -= 1
    if multi_core and nchan > 1 and nchan // c_blk < 2:
        c = max(1, nchan // 2)
        while nchan % c:
            c -= 1
        c_blk = c
    return c_blk


# ----------------------------------------------------------------------------
# public wrapper
# ----------------------------------------------------------------------------
@functools.partial(jax.jit, static_argnums=(2,), static_argnames=("matmul_dtype",))
def gridded_residual_connector(data_vis, model_vis, cell_size, *,
                               matmul_dtype=None):
    """Returns (residuals, amp, phase, cube) matching the torch forward()."""
    nchan, npix, npix2 = data_vis.shape
    assert npix == npix2
    scale = float(1.0 / cell_size ** 2)

    phys_vmem, multi_core = _chip_info()
    cap = _vmem_cap(phys_vmem)

    if matmul_dtype is None:
        # bf16 MXU inputs only where the kernel is compute-bound; the small-npix
        # regime is memory-bound, so f32 keeps full accuracy there for free.
        matmul_dtype = jnp.bfloat16 if npix >= 128 else jnp.float32
    use_gauss = np.dtype(matmul_dtype) == np.dtype(jnp.float32)
    mm_size = np.dtype(matmul_dtype).itemsize

    # symmetric inverse-DFT matrix: W[a, j] = exp(2*pi*i*a*j/npix) / npix
    j = jnp.arange(npix, dtype=jnp.float32)
    theta = (2.0 * np.pi / npix) * jnp.outer(j, j)
    w_re = jnp.cos(theta) / npix
    w_im = jnp.sin(theta) / npix

    # TODO(synk): a production pipeline should carry split re/im planes
    # end-to-end to avoid these complex<->planar conversion HBM passes.
    d_re = jnp.real(data_vis).astype(jnp.float32)
    d_im = jnp.imag(data_vis).astype(jnp.float32)
    m_re = jnp.real(model_vis).astype(jnp.float32)
    m_im = jnp.imag(model_vis).astype(jnp.float32)

    if npix <= 32:
        # ---- Kronecker path: lane-dense (nchan, npix^2) layout end-to-end ---
        P = npix * npix
        k_re = (jnp.kron(w_re, w_re) - jnp.kron(w_im, w_im)).astype(matmul_dtype)
        k_im = (jnp.kron(w_re, w_im) + jnp.kron(w_im, w_re)).astype(matmul_dtype)

        c_blk = _pick_channel_block_kron(nchan, multi_core)
        grid = (nchan // c_blk,)
        vis_spec = pl.BlockSpec((c_blk, P), lambda c: (c, 0))
        k_spec = pl.BlockSpec((P, P), lambda c: (0, 0))
        out_sds = jax.ShapeDtypeStruct((nchan, P), jnp.float32)

        blk = c_blk * P * 4
        est = 10 * 2 * blk + 2 * 2 * P * P * mm_size + 10 * blk + P * P * mm_size
        vmem_limit = int(min(cap, max(32 * 2 ** 20, int(1.3 * est))))

        outs = pl.pallas_call(
            functools.partial(_connector_kernel_kron, scale=scale,
                              gauss=use_gauss),
            out_shape=(out_sds,) * 6,
            grid=grid,
            in_specs=[vis_spec] * 4 + [k_spec] * 2,
            out_specs=(vis_spec,) * 6,
            input_output_aliases={0: 0, 1: 1},   # d_re->res_re, d_im->res_im
            compiler_params=pltpu.CompilerParams(
                dimension_semantics=("parallel",),
                vmem_limit_bytes=vmem_limit),
        )(d_re.reshape(nchan, P), d_im.reshape(nchan, P),
          m_re.reshape(nchan, P), m_im.reshape(nchan, P), k_re, k_im)
        res_re, res_im, amp, phase, cube_re, cube_im = (
            o.reshape(nchan, npix, npix) for o in outs)
    else:
        # ---- two-sided DFT path:  cube = scale * (W @ R @ W) ----------------
        # TODO(synk): for npix >= 512 on v7x a second "arbitrary" grid axis
        # tiling the DFT columns is needed to stay inside 64 MiB of VMEM.
        w_re_c = w_re.astype(matmul_dtype)
        w_im_c = w_im.astype(matmul_dtype)

        c_blk = _pick_channel_block_dft(nchan, npix, multi_core)
        grid = (nchan // c_blk,)
        vis_spec = pl.BlockSpec((c_blk, npix, npix), lambda c: (c, 0, 0))
        w_spec = pl.BlockSpec((npix, npix), lambda c: (0, 0))
        out_sds = jax.ShapeDtypeStruct((nchan, npix, npix), jnp.float32)

        blk = c_blk * npix * npix * 4
        w_bytes = npix * npix * mm_size
        est = 10 * 2 * blk + 2 * 2 * w_bytes + 14 * blk + w_bytes
        vmem_limit = int(min(cap, max(32 * 2 ** 20, int(1.3 * est))))

        res_re, res_im, amp, phase, cube_re, cube_im = pl.pallas_call(
            functools.partial(_connector_kernel_dft, scale=scale,
                              gauss=use_gauss),
            out_shape=(out_sds,) * 6,
            grid=grid,
            in_specs=[vis_spec] * 4 + [w_spec] * 2,
            out_specs=(vis_spec,) * 6,
            input_output_aliases={0: 0, 1: 1},
            compiler_params=pltpu.CompilerParams(
                dimension_semantics=("parallel",),
                vmem_limit_bytes=vmem_limit),
        )(d_re, d_im, m_re, m_im, w_re_c, w_im_c)

    residuals = lax.complex(res_re, res_im)
    cube = lax.complex(cube_re, cube_im)
    return residuals, amp, phase, cube


# ----------------------------------------------------------------------------
# self-test
# ----------------------------------------------------------------------------
if __name__ == "__main__":
    cell_size = 0.005

    def run_case(nchan, npix, key):
        k1, k2 = jax.random.split(key)
        # Visibilities of real-valued sky images (Hermitian), so the dirty
        # image of the residuals is real -- mirrors the module's assertion.
        img_data = jax.random.normal(k1, (nchan, npix, npix), dtype=jnp.float32)
        img_model = jax.random.normal(k2, (nchan, npix, npix), dtype=jnp.float32)
        data_vis = jnp.fft.fftn(img_data, axes=(1, 2)).astype(jnp.complex64)
        model_vis = jnp.fft.fftn(img_model, axes=(1, 2)).astype(jnp.complex64)

        residuals, amp, phase, cube = jax.block_until_ready(
            gridded_residual_connector(data_vis, model_vis, cell_size))

        # pure-JAX reference of the torch forward()
        ref_res = data_vis - model_vis
        ref_cube = (1.0 / cell_size ** 2) * jnp.fft.ifftn(ref_res, axes=(1, 2))

        assert jnp.allclose(residuals, ref_res, atol=1e-5), "residuals mismatch"
        assert jnp.allclose(amp, jnp.abs(ref_res), rtol=1e-4, atol=1e-3), \
            "amp mismatch"

        dphi = jnp.abs(phase - jnp.angle(ref_res))
        dphi = jnp.minimum(dphi, 2.0 * np.pi - dphi)      # compare modulo 2*pi
        assert float(jnp.max(dphi)) < 2e-3, "phase mismatch"

        max_abs = float(jnp.max(jnp.abs(jnp.real(cube))))
        assert float(jnp.max(jnp.abs(jnp.imag(cube)))) < 1e-3 * max_abs, \
            "dirty image contained substantial imaginary values"
        assert jnp.allclose(jnp.real(cube), jnp.real(ref_cube),
                            rtol=1e-3, atol=1e-3 * max_abs), "cube mismatch"

    key = jax.random.PRNGKey(0)
    k1, k2 = jax.random.split(key)
    run_case(4, 16, k1)     # lane-dense Kronecker path (npix <= 32)
    run_case(2, 64, k2)     # two-sided DFT path
    print("KERNEL_OK")
</pallas_src>

<mosaic_0001>
module attributes {stable_mosaic.version = 11 : i64} {
  func.func @_connector_kernel_kron(%arg0: i32, %arg1: memref<4x256xf32, #tpu.memory_space<vmem>>, %arg2: memref<4x256xf32, #tpu.memory_space<vmem>>, %arg3: memref<4x256xf32, #tpu.memory_space<vmem>>, %arg4: memref<4x256xf32, #tpu.memory_space<vmem>>, %arg5: memref<256x256xf32, #tpu.memory_space<vmem>>, %arg6: memref<256x256xf32, #tpu.memory_space<vmem>>, %arg7: memref<4x256xf32, #tpu.memory_space<vmem>>, %arg8: memref<4x256xf32, #tpu.memory_space<vmem>>, %arg9: memref<4x256xf32, #tpu.memory_space<vmem>>, %arg10: memref<4x256xf32, #tpu.memory_space<vmem>>, %arg11: memref<4x256xf32, #tpu.memory_space<vmem>>, %arg12: memref<4x256xf32, #tpu.memory_space<vmem>>) attributes {dimension_semantics = [#tpu.dimension_semantics<parallel>], iteration_bounds = array<i64: 1>, scalar_prefetch = 0 : i64, scratch_operands = 0 : i64, tpu.core_type = #tpu.core_type<tc>, window_params = [{transform_indices = @transform_0, window_bounds = array<i64: 4, 256>}, {transform_indices = @transform_1, window_bounds = array<i64: 4, 256>}, {transform_indices = @transform_2, window_bounds = array<i64: 4, 256>}, {transform_indices = @transform_3, window_bounds = array<i64: 4, 256>}, {pipeline_mode = #tpu.pipeline_mode<synchronous>, transform_indices = @transform_4, window_bounds = array<i64: 256, 256>}, {pipeline_mode = #tpu.pipeline_mode<synchronous>, transform_indices = @transform_5, window_bounds = array<i64: 256, 256>}, {transform_indices = @transform_6, window_bounds = array<i64: 4, 256>}, {transform_indices = @transform_7, window_bounds = array<i64: 4, 256>}, {transform_indices = @transform_8, window_bounds = array<i64: 4, 256>}, {transform_indices = @transform_9, window_bounds = array<i64: 4, 256>}, {transform_indices = @transform_10, window_bounds = array<i64: 4, 256>}, {transform_indices = @transform_11, window_bounds = array<i64: 4, 256>}]} {
    %c0 = arith.constant 0 : index
    %c0_0 = arith.constant 0 : index
    %0 = vector.load %arg1[%c0, %c0_0] : memref<4x256xf32, #tpu.memory_space<vmem>>, vector<4x256xf32>
    %c0_1 = arith.constant 0 : index
    %c0_2 = arith.constant 0 : index
    %1 = vector.load %arg3[%c0_1, %c0_2] : memref<4x256xf32, #tpu.memory_space<vmem>>, vector<4x256xf32>
    %2 = arith.subf %0, %1 : vector<4x256xf32>
    %c0_3 = arith.constant 0 : index
    %c0_4 = arith.constant 0 : index
    %3 = vector.load %arg2[%c0_3, %c0_4] : memref<4x256xf32, #tpu.memory_space<vmem>>, vector<4x256xf32>
    %c0_5 = arith.constant 0 : index
    %c0_6 = arith.constant 0 : index
    %4 = vector.load %arg4[%c0_5, %c0_6] : memref<4x256xf32, #tpu.memory_space<vmem>>, vector<4x256xf32>
    %5 = arith.subf %3, %4 : vector<4x256xf32>
    %c0_7 = arith.constant 0 : index
    %c0_8 = arith.constant 0 : index
    %6 = vector.load %arg7[%c0_7, %c0_8] : memref<4x256xf32, #tpu.memory_space<vmem>>, vector<4x256xf32>
    tpu.vector_store %arg7[%c0_7, %c0_8], %2 {strides = array<i32>} : memref<4x256xf32, #tpu.memory_space<vmem>>, vector<4x256xf32>,
    %c0_9 = arith.constant 0 : index
    %c0_10 = arith.constant 0 : index
    %7 = vector.load %arg8[%c0_9, %c0_10] : memref<4x256xf32, #tpu.memory_space<vmem>>, vector<4x256xf32>
    tpu.vector_store %arg8[%c0_9, %c0_10], %5 {strides = array<i32>} : memref<4x256xf32, #tpu.memory_space<vmem>>, vector<4x256xf32>,
    %8 = arith.mulf %2, %2 : vector<4x256xf32>
    %9 = arith.mulf %5, %5 : vector<4x256xf32>
    %10 = arith.addf %8, %9 : vector<4x256xf32>
    %11 = math.sqrt %10 : vector<4x256xf32>
    %c0_11 = arith.constant 0 : index
    %c0_12 = arith.constant 0 : index
    %12 = vector.load %arg9[%c0_11, %c0_12] : memref<4x256xf32, #tpu.memory_space<vmem>>, vector<4x256xf32>
    tpu.vector_store %arg9[%c0_11, %c0_12], %11 {strides = array<i32>} : memref<4x256xf32, #tpu.memory_space<vmem>>, vector<4x256xf32>,
    %cst = arith.constant 0.000000e+00 : f32
    %13 = vector.broadcast %cst : f32 to vector<4x256xf32>
    %14 = arith.cmpf oeq, %2, %13 : vector<4x256xf32>
    %cst_13 = arith.constant 1.000000e+00 : f32
    %15 = vector.broadcast %cst_13 : f32 to vector<4x256xf32>
    %16 = arith.select %14, %15, %2 : vector<4x256xi1>, vector<4x256xf32>
    %17 = math.absf %5 : vector<4x256xf32>
    %18 = math.absf %16 : vector<4x256xf32>
    %cst_14 = arith.constant 1.000000e-30 : f32
    %19 = vector.broadcast %cst_14 : f32 to vector<4x256xf32>
    %20 = arith.maximumf %18, %19 : vector<4x256xf32>
    %21 = tpu.reciprocal %20 {approx = true} : vector<4x256xf32> -> vector<4x256xf32>
    %22 = arith.mulf %20, %21 : vector<4x256xf32>
    %cst_15 = arith.constant 2.000000e+00 : f32
    %23 = vector.broadcast %cst_15 : f32 to vector<4x256xf32>
    %24 = arith.subf %23, %22 : vector<4x256xf32>
    %25 = arith.mulf %21, %24 : vector<4x256xf32>
    %26 = arith.mulf %17, %25 : vector<4x256xf32>
    %cst_16 = arith.constant 1.000000e+30 : f32
    %27 = vector.broadcast %cst_16 : f32 to vector<4x256xf32>
    %28 = arith.minimumf %26, %27 : vector<4x256xf32>
    %cst_17 = arith.constant 2.41421366 : f32
    %29 = vector.broadcast %cst_17 : f32 to vector<4x256xf32>
    %30 = arith.cmpf ogt, %28, %29 : vector<4x256xf32>
    %cst_18 = arith.constant 0.414213568 : f32
    %31 = vector.broadcast %cst_18 : f32 to vector<4x256xf32>
    %32 = arith.cmpf ogt, %28, %31 : vector<4x256xf32>
    %cst_19 = arith.constant dense<true> : vector<4x256xi1>
    %33 = arith.xori %30, %cst_19 : vector<4x256xi1>
    %34 = arith.andi %32, %33 : vector<4x256xi1>
    %cst_20 = arith.constant 1.000000e-30 : f32
    %35 = vector.broadcast %cst_20 : f32 to vector<4x256xf32>
    %36 = arith.maximumf %28, %35 : vector<4x256xf32>
    %37 = tpu.reciprocal %36 {approx = true} : vector<4x256xf32> -> vector<4x256xf32>
    %38 = arith.mulf %36, %37 : vector<4x256xf32>
    %cst_21 = arith.constant 2.000000e+00 : f32
    %39 = vector.broadcast %cst_21 : f32 to vector<4x256xf32>
    %40 = arith.subf %39, %38 : vector<4x256xf32>
    %41 = arith.mulf %37, %40 : vector<4x256xf32>
    %cst_22 = arith.constant 1.000000e+00 : f32
    %42 = vector.broadcast %cst_22 : f32 to vector<4x256xf32>
    %43 = arith.addf %28, %42 : vector<4x256xf32>
    %44 = tpu.reciprocal %43 {approx = true} : vector<4x256xf32> -> vector<4x256xf32>
    %45 = arith.mulf %43, %44 : vector<4x256xf32>
    %cst_23 = arith.constant 2.000000e+00 : f32
    %46 = vector.broadcast %cst_23 : f32 to vector<4x256xf32>
    %47 = arith.subf %46, %45 : vector<4x256xf32>
    %48 = arith.mulf %44, %47 : vector<4x256xf32>
    %cst_24 = arith.constant 0.000000e+00 : f32
    %49 = vector.broadcast %cst_24 : f32 to vector<4x256xf32>
    %50 = arith.subf %49, %41 : vector<4x256xf32>
    %cst_25 = arith.constant 1.000000e+00 : f32
    %51 = vector.broadcast %cst_25 : f32 to vector<4x256xf32>
    %52 = arith.subf %28, %51 : vector<4x256xf32>
    %53 = arith.mulf %52, %48 : vector<4x256xf32>
    %54 = arith.select %34, %53, %28 : vector<4x256xi1>, vector<4x256xf32>
    %55 = arith.select %30, %50, %54 : vector<4x256xi1>, vector<4x256xf32>
    %cst_26 = arith.constant 0.785398185 : f32
    %cst_27 = arith.constant 0.000000e+00 : f32
    %56 = vector.broadcast %cst_26 : f32 to vector<4x256xf32>
    %57 = vector.broadcast %cst_27 : f32 to vector<4x256xf32>
    %58 = arith.select %34, %56, %57 : vector<4x256xi1>, vector<4x256xf32>
    %cst_28 = arith.constant 1.57079637 : f32
    %59 = vector.broadcast %cst_28 : f32 to vector<4x256xf32>
    %60 = arith.select %30, %59, %58 : vector<4x256xi1>, vector<4x256xf32>
    %61 = arith.mulf %55, %55 : vector<4x256xf32>
    %cst_29 = arith.constant 0.0805374458 : f32
    %62 = vector.broadcast %cst_29 : f32 to vector<4x256xf32>
    %63 = arith.mulf %62, %61 : vector<4x256xf32>
    %cst_30 = arith.constant 0.138776854 : f32
    %64 = vector.broadcast %cst_30 : f32 to vector<4x256xf32>
    %65 = arith.subf %63, %64 : vector<4x256xf32>
    %66 = arith.mulf %65, %61 : vector<4x256xf32>
    %cst_31 = arith.constant 0.199777111 : f32
    %67 = vector.broadcast %cst_31 : f32 to vector<4x256xf32>
    %68 = arith.addf %66, %67 : vector<4x256xf32>
    %69 = arith.mulf %68, %61 : vector<4x256xf32>
    %cst_32 = arith.constant 0.333329499 : f32
    %70 = vector.broadcast %cst_32 : f32 to vector<4x256xf32>
    %71 = arith.subf %69, %70 : vector<4x256xf32>
    %72 = arith.mulf %71, %61 : vector<4x256xf32>
    %73 = arith.mulf %72, %55 : vector<4x256xf32>
    %74 = arith.addf %60, %73 : vector<4x256xf32>
    %75 = arith.addf %74, %55 : vector<4x256xf32>
    %cst_33 = arith.constant 0.000000e+00 : f32
    %76 = vector.broadcast %cst_33 : f32 to vector<4x256xf32>
    %77 = arith.cmpf ogt, %2, %76 : vector<4x256xf32>
    %cst_34 = arith.constant 3.14159274 : f32
    %78 = vector.broadcast %cst_34 : f32 to vector<4x256xf32>
    %79 = arith.subf %78, %75 : vector<4x256xf32>
    %80 = arith.select %77, %75, %79 : vector<4x256xi1>, vector<4x256xf32>
    %cst_35 = arith.constant 0.000000e+00 : f32
    %81 = vector.broadcast %cst_35 : f32 to vector<4x256xf32>
    %82 = arith.cmpf oeq, %2, %81 : vector<4x256xf32>
    %cst_36 = arith.constant 1.57079637 : f32
    %83 = vector.broadcast %cst_36 : f32 to vector<4x256xf32>
    %84 = arith.select %82, %83, %80 : vector<4x256xi1>, vector<4x256xf32>
    %cst_37 = arith.constant 0.000000e+00 : f32
    %85 = vector.broadcast %cst_37 : f32 to vector<4x256xf32>
    %86 = arith.cmpf oeq, %2, %85 : vector<4x256xf32>
    %cst_38 = arith.constant 0.000000e+00 : f32
    %87 = vector.broadcast %cst_38 : f32 to vector<4x256xf32>
    %88 = arith.cmpf oeq, %5, %87 : vector<4x256xf32>
    %89 = arith.andi %86, %88 : vector<4x256xi1>
    %cst_39 = arith.constant 0.000000e+00 : f32
    %90 = vector.broadcast %cst_39 : f32 to vector<4x256xf32>
    %91 = arith.select %89, %90, %84 : vector<4x256xi1>, vector<4x256xf32>
    %cst_40 = arith.constant 0.000000e+00 : f32
    %92 = vector.broadcast %cst_40 : f32 to vector<4x256xf32>
    %93 = arith.cmpf olt, %5, %92 : vector<4x256xf32>
    %cst_41 = arith.constant 0.000000e+00 : f32
    %94 = vector.broadcast %cst_41 : f32 to vector<4x256xf32>
    %95 = arith.subf %94, %91 : vector<4x256xf32>
    %96 = arith.select %93, %95, %91 : vector<4x256xi1>, vector<4x256xf32>
    %c0_42 = arith.constant 0 : index
    %c0_43 = arith.constant 0 : index
    %97 = vector.load %arg10[%c0_42, %c0_43] : memref<4x256xf32, #tpu.memory_space<vmem>>, vector<4x256xf32>
    tpu.vector_store %arg10[%c0_42, %c0_43], %96 {strides = array<i32>} : memref<4x256xf32, #tpu.memory_space<vmem>>, vector<4x256xf32>,
    %c0_44 = arith.constant 0 : index
    %c0_45 = arith.constant 0 : index
    %98 = vector.load %arg5[%c0_44, %c0_45] : memref<256x256xf32, #tpu.memory_space<vmem>>, vector<256x256xf32>
    %c0_46 = arith.constant 0 : index
    %c0_47 = arith.constant 0 : index
    %99 = vector.load %arg6[%c0_46, %c0_47] : memref<256x256xf32, #tpu.memory_space<vmem>>, vector<256x256xf32>
    %cst_48 = arith.constant dense<0.000000e+00> : vector<4x256xf32>
    %100 = tpu.matmul %2, %98, %cst_48 {dimension_numbers = #tpu.dot_dimension_numbers<[1], [0], [0], [1], [0, 0, 1, 1], [], []>} : vector<4x256xf32>, vector<256x256xf32>, vector<4x256xf32> -> vector<4x256xf32>
    %cst_49 = arith.constant dense<0.000000e+00> : vector<4x256xf32>
    %101 = tpu.matmul %5, %99, %cst_49 {dimension_numbers = #tpu.dot_dimension_numbers<[1], [0], [0], [1], [0, 0, 1, 1], [], []>} : vector<4x256xf32>, vector<256x256xf32>, vector<4x256xf32> -> vector<4x256xf32>
    %102 = arith.addf %98, %99 : vector<256x256xf32>
    %103 = arith.addf %2, %5 : vector<4x256xf32>
    %cst_50 = arith.constant dense<0.000000e+00> : vector<4x256xf32>
    %104 = tpu.matmul %103, %102, %cst_50 {dimension_numbers = #tpu.dot_dimension_numbers<[1], [0], [0], [1], [0, 0, 1, 1], [], []>} : vector<4x256xf32>, vector<256x256xf32>, vector<4x256xf32> -> vector<4x256xf32>
    %105 = arith.subf %104, %100 : vector<4x256xf32>
    %106 = arith.subf %105, %101 : vector<4x256xf32>
    %107 = arith.subf %100, %101 : vector<4x256xf32>
    %cst_51 = arith.constant 4.000000e+04 : f32
    %108 = vector.broadcast %cst_51 : f32 to vector<4x256xf32>
    %109 = arith.mulf %108, %107 : vector<4x256xf32>
    %c0_52 = arith.constant 0 : index
    %c0_53 = arith.constant 0 : index
    %110 = vector.load %arg11[%c0_52, %c0_53] : memref<4x256xf32, #tpu.memory_space<vmem>>, vector<4x256xf32>
    tpu.vector_store %arg11[%c0_52, %c0_53], %109 {strides = array<i32>} : memref<4x256xf32, #tpu.memory_space<vmem>>, vector<4x256xf32>,
    %cst_54 = arith.constant 4.000000e+04 : f32
    %111 = vector.broadcast %cst_54 : f32 to vector<4x256xf32>
    %112 = arith.mulf %111, %106 : vector<4x256xf32>
    %c0_55 = arith.constant 0 : index
    %c0_56 = arith.constant 0 : index
    %113 = vector.load %arg12[%c0_55, %c0_56] : memref<4x256xf32, #tpu.memory_space<vmem>>, vector<4x256xf32>
    tpu.vector_store %arg12[%c0_55, %c0_56], %112 {strides = array<i32>} : memref<4x256xf32, #tpu.memory_space<vmem>>, vector<4x256xf32>,
    return
  }
  func.func @transform_0(%arg0: i32) -> (i32, i32) {
    %c0_i32 = arith.constant 0 : i32
    %c0_i32_0 = arith.constant 0 : i32
    return %arg0, %c0_i32 : i32, i32
  }
  func.func @transform_1(%arg0: i32) -> (i32, i32) {
    %c0_i32 = arith.constant 0 : i32
    %c0_i32_0 = arith.constant 0 : i32
    return %arg0, %c0_i32 : i32, i32
  }
  func.func @transform_2(%arg0: i32) -> (i32, i32) {
    %c0_i32 = arith.constant 0 : i32
    %c0_i32_0 = arith.constant 0 : i32
    return %arg0, %c0_i32 : i32, i32
  }
  func.func @transform_3(%arg0: i32) -> (i32, i32) {
    %c0_i32 = arith.constant 0 : i32
    %c0_i32_0 = arith.constant 0 : i32
    return %arg0, %c0_i32 : i32, i32
  }
  func.func @transform_4(%arg0: i32) -> (i32, i32) {
    %c0_i32 = arith.constant 0 : i32
    %c0_i32_0 = arith.constant 0 : i32
    %c0_i32_1 = arith.constant 0 : i32
    return %c0_i32, %c0_i32_0 : i32, i32
  }
  func.func @transform_5(%arg0: i32) -> (i32, i32) {
    %c0_i32 = arith.constant 0 : i32
    %c0_i32_0 = arith.constant 0 : i32
    %c0_i32_1 = arith.constant 0 : i32
    return %c0_i32, %c0_i32_0 : i32, i32
  }
  func.func @transform_6(%arg0: i32) -> (i32, i32) {
    %c0_i32 = arith.constant 0 : i32
    %c0_i32_0 = arith.constant 0 : i32
    return %arg0, %c0_i32 : i32, i32
  }
  func.func @transform_7(%arg0: i32) -> (i32, i32) {
    %c0_i32 = arith.constant 0 : i32
    %c0_i32_0 = arith.constant 0 : i32
    return %arg0, %c0_i32 : i32, i32
  }
  func.func @transform_8(%arg0: i32) -> (i32, i32) {
    %c0_i32 = arith.constant 0 : i32
    %c0_i32_0 = arith.constant 0 : i32
    return %arg0, %c0_i32 : i32, i32
  }
  func.func @transform_9(%arg0: i32) -> (i32, i32) {
    %c0_i32 = arith.constant 0 : i32
    %c0_i32_0 = arith.constant 0 : i32
    return %arg0, %c0_i32 : i32, i32
  }
  func.func @transform_10(%arg0: i32) -> (i32, i32) {
    %c0_i32 = arith.constant 0 : i32
    %c0_i32_0 = arith.constant 0 : i32
    return %arg0, %c0_i32 : i32, i32
  }
  func.func @transform_11(%arg0: i32) -> (i32, i32) {
    %c0_i32 = arith.constant 0 : i32
    %c0_i32_0 = arith.constant 0 : i32
    return %arg0, %c0_i32 : i32, i32
  }
}

</mosaic_0001>

<bundles_post_ra>
// kernel: custom-call
= control target key start
LH: loop header
LB: loop body
LE: loop exit
PB: predicated region body
PF: predicated region fallthrough
CT: control target
= control target key end

     0   :  { %2 = vsyncpa [#allocation0], 0  ;;  %s55_s0 = inlined_call_operand.hbm [shape: c64[4,16,16], index: 0, kind: input, shape index: {}]   ;;  %s56_s1 = inlined_call_operand.vmem [shape: f32[4,16,16], index: 1, kind: output, shape index: {}]  }
   0x1   :  { %s4_s8 = sshll.u32 %s55_s0, 4  ;;  %s6_s11 = sshll.u32 %s56_s1, 4  ;;  %s5_s8 = int_to_ptr.hbm [resolvable:$true] %s4_s8  ;;  %s7_s11 = int_to_ptr.vmem [resolvable:$true] %s6_s11 }
   0x2   :  { %9 = dma.hbm_to_vmem [thread:$0]  %s5_s8, 1024, %s7_s11, [#allocation0] }
   0x3   :  { %37 = dma.done.wait [#allocation0], 1024  }
   0x4   :  { %38 = vsyncadd [#allocation0], 4294966272 }
   0x5   :  { %12 = vsyncpa [#allocation0], 1 }

// kernel: custom-call.1
= control target key start
LH: loop header
LB: loop body
LE: loop exit
PB: predicated region body
PF: predicated region fallthrough
CT: control target
= control target key end

     0   :  { %s56_s0 = inlined_call_operand.hbm [shape: c64[4,16,16], index: 0, kind: input, shape index: {}]   ;;  %s57_s1 = inlined_call_operand.vmem [shape: f32[4,16,16], index: 1, kind: output, shape index: {}]  }
   0x1   :  { %s2_s8 = scalar_lea.hbm %s56_s0, 64 }
   0x2   :  { %3 = vsyncpa [#allocation0], 0  ;;  %s5_s9 = sshll.u32 %s2_s8, 4  ;;  %s7_s12 = sshll.u32 %s57_s1, 4  ;;  %s6_s9 = int_to_ptr.hbm [resolvable:$true] %s5_s9  ;;  %s8_s12 = int_to_ptr.vmem [resolvable:$true] %s7_s12 }
   0x3   :  { %10 = dma.hbm_to_vmem [thread:$0]  %s6_s9, 1024, %s8_s12, [#allocation0] }
   0x4   :  { %38 = dma.done.wait [#allocation0], 1024  }
   0x5   :  { %39 = vsyncadd [#allocation0], 4294966272 }
   0x6   :  { %13 = vsyncpa [#allocation0], 1 }

// kernel: custom-call.5
= control target key start
LH: loop header
LB: loop body
LE: loop exit
PB: predicated region body
PF: predicated region fallthrough
CT: control target
= control target key end

     0   :  { %s105_s0 = inlined_call_operand.vmem [shape: f32[4,16,16], index: 0, kind: input, shape index: {}]   ;;  %s106_s1 = inlined_call_operand.vmem [shape: f32[4,16,16], index: 1, kind: input, shape index: {}]   ;;  %s107_s2 = inlined_call_operand.hbm [shape: c64[4,16,16], index: 2, kind: output, shape index: {}]  }
   0x1   :  { %s3_s11 = scalar_lea.hbm %s107_s2, 64 }
   0x2   :  { %4 = vsyncpa [#allocation0], 0  ;;  %s6_s14 = sshll.u32 %s105_s0, 4  ;;  %s8_s17 = sshll.u32 %s107_s2, 4  ;;  %s7_s14 = int_to_ptr.vmem [resolvable:$true] %s6_s14  ;;  %s9_s17 = int_to_ptr.hbm [resolvable:$true] %s8_s17 }
   0x3   :  { %11 = dma.vmem_to_hbm [thread:$0]  %s7_s14, 1024, %s9_s17, [#allocation0] }
   0x4   :  { %74 = dma.done.wait [#allocation0], 1024  }
   0x5   :  { %75 = vsyncadd [#allocation0], 4294966272 }
   0x6   :  { %14 = vsyncpa [#allocation0], 1 }
   0x7   :  { %15 = vsyncpa [#allocation1], 0  ;;  %s17_s20 = sshll.u32 %s106_s1, 4  ;;  %s19_s21 = sshll.u32 %s3_s11, 4  ;;  %s18_s20 = int_to_ptr.vmem [resolvable:$true] %s17_s20  ;;  %s20_s21 = int_to_ptr.hbm [resolvable:$true] %s19_s21 }
   0x8   :  { %22 = dma.vmem_to_hbm [thread:$0]  %s18_s20, 1024, %s20_s21, [#allocation1] }
   0x9   :  { %76 = dma.done.wait [#allocation1], 1024  }
   0xa   :  { %77 = vsyncadd [#allocation1], 4294966272 }
   0xb   :  { %25 = vsyncpa [#allocation1], 1 }

// kernel: gridded_residual_connector.1
= control target key start
LH: loop header
LB: loop body
LE: loop exit
PB: predicated region body
PF: predicated region fallthrough
CT: control target
= control target key end

     0   :  { %vm618_vm5 = vmmov 1   ;;  %vm569_vm12 = vcmask 1043456   ;;  %s1705_s4 = inlined_call_operand.vmem [shape: f32[256,256], index: 4, kind: input, shape index: {}]   ;;  %s1706_s5 = inlined_call_operand.vmem [shape: f32[256,256], index: 5, kind: input, shape index: {}]   ;;  %s1707_s0 = inlined_call_operand.vmem [shape: f32[4,256], index: 0, kind: input, shape index: {}, may-alias: {0,6}]   ;;  %s1708_s2 = inlined_call_operand.vmem [shape: f32[4,256], index: 2, kind: input, shape index: {}]   ;;  %s1709_s1 = inlined_call_operand.vmem [shape: f32[4,256], index: 1, kind: input, shape index: {}, may-alias: {1,7}]   ;;  %s1710_s3 = inlined_call_operand.vmem [shape: f32[4,256], index: 3, kind: input, shape index: {}]   ;;  %s1711_s6 = inlined_call_operand.vmem [shape: f32[4,256], index: 6, kind: output, shape index: {0}, may-alias: {0,6}]   ;;  %s1712_s7 = inlined_call_operand.vmem [shape: f32[4,256], index: 7, kind: output, shape index: {1}, may-alias: {1,7}]   ;;  %s1713_s8 = inlined_call_operand.vmem [shape: f32[4,256], index: 8, kind: output, shape index: {2}]   ;;  %s1714_s9 = inlined_call_operand.vmem [shape: f32[4,256], index: 9, kind: output, shape index: {3}]   ;;  %s1715_s10 = inlined_call_operand.vmem [shape: f32[4,256], index: 10, kind: output, shape index: {4}]   ;;  %s1716_s11 = inlined_call_operand.vmem [shape: f32[4,256], index: 11, kind: output, shape index: {5}]  }
   0x1   :  { %v683_v0 = vld [vmem:[%s1705_s4 + $0xf0] sm:$0xff]  ;;  %v693_v2 = vld [vmem:[%s1705_s4 + $0xf8] sm:$0xff]  ;;  %v705_v4 = vld [vmem:[%s1705_s4 + $0xe0] sm:$0xff] }
   0x2   :  { %v688_v1 = vld [vmem:[%s1705_s4 + $0x1f0] sm:$0xff]  ;;  %241 = vmatpush.msra.mxu0 %v683_v0  ;;  %v700_v3 = vld [vmem:[%s1705_s4 + $0x1f8] sm:$0xff]  ;;  %v710_v5 = vld [vmem:[%s1705_s4 + $0x1e0] sm:$0xff]  ;;  %281 = vmatpush.msra.mxu2 %v693_v2 }
   0x3   :  { %261 = vmatpush.msra.mxu1 %v688_v1  ;;  %301 = vmatpush.msra.mxu3 %v700_v3  ;;  %v717_v6 = vld [vmem:[%s1705_s4 + $0xe8] sm:$0xff]  ;;  %v727_v8 = vld [vmem:[%s1705_s4 + $0xd0] sm:$0xff]  ;;  %v739_v10 = vld [vmem:[%s1705_s4 + $0xd8] sm:$0xff] }
   0x4   :  { %v722_v7 = vld [vmem:[%s1705_s4 + $0x1e8] sm:$0xff]  ;;  %242 = vmatpush.msra.mxu0 %v705_v4  ;;  %v734_v9 = vld [vmem:[%s1705_s4 + $0x1d0] sm:$0xff]  ;;  %v744_v11 = vld [vmem:[%s1705_s4 + $0x1d8] sm:$0xff]  ;;  %282 = vmatpush.msra.mxu2 %v717_v6 }
   0x5   :  { %262 = vmatpush.msra.mxu1 %v710_v5  ;;  %302 = vmatpush.msra.mxu3 %v722_v7  ;;  %v751_v12 = vld [vmem:[%s1705_s4 + $0xc0] sm:$0xff]  ;;  %v763_v14 = vld [vmem:[%s1705_s4 + $0xc8] sm:$0xff]  ;;  %v775_v16 = vld [vmem:[%s1705_s4 + $0xb0] sm:$0xff] }
   0x6   :  { %v756_v13 = vld [vmem:[%s1705_s4 + $0x1c0] sm:$0xff]  ;;  %243 = vmatpush.msra.mxu0 %v727_v8  ;;  %v768_v15 = vld [vmem:[%s1705_s4 + $0x1c8] sm:$0xff]  ;;  %283 = vmatpush.msra.mxu2 %v739_v10  ;;  %v780_v17 = vld [vmem:[%s1705_s4 + $0x1b0] sm:$0xff] }
   0x7   :  { %263 = vmatpush.msra.mxu1 %v734_v9  ;;  %303 = vmatpush.msra.mxu3 %v744_v11  ;;  %v787_v18 = vld [vmem:[%s1705_s4 + $0xb8] sm:$0xff]  ;;  %v799_v20 = vld [vmem:[%s1705_s4 + $0xa0] sm:$0xff]  ;;  %v811_v22 = vld [vmem:[%s1705_s4 + $0xa8] sm:$0xff] }
   0x8   :  { %244 = vmatpush.msra.mxu0 %v751_v12  ;;  %v792_v19 = vld [vmem:[%s1705_s4 + $0x1b8] sm:$0xff]  ;;  %284 = vmatpush.msra.mxu2 %v763_v14  ;;  %v804_v21 = vld [vmem:[%s1705_s4 + $0x1a0] sm:$0xff]  ;;  %1800 = vst [vmem:[#allocation2_spill] sm:$0xff] %v811_v22  ;;  %v816_v23 = vld [vmem:[%s1705_s4 + $0x1a8] sm:$0xff] }
   0x9   :  { %264 = vmatpush.msra.mxu1 %v756_v13  ;;  %304 = vmatpush.msra.mxu3 %v768_v15  ;;  %1801 = vst [vmem:[#allocation3_spill] sm:$0xff] %v816_v23  ;;  %v823_v24 = vld [vmem:[%s1705_s4 + $0x90] sm:$0xff]  ;;  %v835_v26 = vld [vmem:[%s1705_s4 + $0x98] sm:$0xff]  ;;  %v847_v28 = vld [vmem:[%s1705_s4 + $0x80] sm:$0xff] }
   0xa   :  { %245 = vmatpush.msra.mxu0 %v775_v16  ;;  %285 = vmatpush.msra.mxu2 %v787_v18  ;;  %1802 = vst [vmem:[#allocation4_spill] sm:$0xff] %v823_v24  ;;  %v828_v25 = vld [vmem:[%s1705_s4 + $0x190] sm:$0xff]  ;;  %v840_v27 = vld [vmem:[%s1705_s4 + $0x198] sm:$0xff]  ;;  %v852_v29 = vld [vmem:[%s1705_s4 + $0x180] sm:$0xff] }
   0xb   :  { %265 = vmatpush.msra.mxu1 %v780_v17  ;;  %305 = vmatpush.msra.mxu3 %v792_v19  ;;  %1803 = vst [vmem:[#allocation5_spill] sm:$0xff] %v828_v25  ;;  %v859_v30 = vld [vmem:[%s1705_s4 + $0x88] sm:$0xff]  ;;  %v871_v32 = vld [vmem:[%s1705_s4 + $0x70] sm:$0xff]  ;;  %v883_v34 = vld [vmem:[%s1705_s4 + $0x78] sm:$0xff] }
   0xc   :  { %246 = vmatpush.msra.mxu0 %v799_v20  ;;  %1804 = vst [vmem:[#allocation6_spill] sm:$0xff] %v835_v26  ;;  %286 = vmatpush.msra.mxu2 %v811_v22  ;;  %v864_v31 = vld [vmem:[%s1705_s4 + $0x188] sm:$0xff]  ;;  %v876_v33 = vld [vmem:[%s1705_s4 + $0x170] sm:$0xff]  ;;  %v888_v35 = vld [vmem:[%s1705_s4 + $0x178] sm:$0xff] }
   0xd   :  { %266 = vmatpush.msra.mxu1 %v804_v21  ;;  %1805 = vst [vmem:[#allocation7_spill] sm:$0xff] %v840_v27  ;;  %306 = vmatpush.msra.mxu3 %v816_v23  ;;  %v895_v36 = vld [vmem:[%s1705_s4 + $0x60] sm:$0xff]  ;;  %v907_v38 = vld [vmem:[%s1705_s4 + $0x68] sm:$0xff]  ;;  %v919_v40 = vld [vmem:[%s1705_s4 + $0x50] sm:$0xff] }
   0xe   :  { %1806 = vst [vmem:[#allocation8_spill] sm:$0xff] %v847_v28  ;;  %247 = vmatpush.msra.mxu0 %v823_v24  ;;  %287 = vmatpush.msra.mxu2 %v835_v26  ;;  %v900_v37 = vld [vmem:[%s1705_s4 + $0x160] sm:$0xff]  ;;  %v912_v39 = vld [vmem:[%s1705_s4 + $0x168] sm:$0xff]  ;;  %v924_v41 = vld [vmem:[%s1705_s4 + $0x150] sm:$0xff] }
   0xf   :  { %1807 = vst [vmem:[#allocation9_spill] sm:$0xff] %v852_v29  ;;  %267 = vmatpush.msra.mxu1 %v828_v25  ;;  %307 = vmatpush.msra.mxu3 %v840_v27  ;;  %v931_v42 = vld [vmem:[%s1705_s4 + $0x58] sm:$0xff]  ;;  %v943_v44 = vld [vmem:[%s1705_s4 + $0x40] sm:$0xff]  ;;  %v955_v46 = vld [vmem:[%s1705_s4 + $0x48] sm:$0xff] }
  0x10   :  { %1808 = vst [vmem:[#allocation10_spill] sm:$0xff] %v859_v30  ;;  %248 = vmatpush.msra.mxu0 %v847_v28  ;;  %288 = vmatpush.msra.mxu2 %v859_v30  ;;  %v936_v43 = vld [vmem:[%s1705_s4 + $0x158] sm:$0xff]  ;;  %v948_v45 = vld [vmem:[%s1705_s4 + $0x140] sm:$0xff]  ;;  %v960_v47 = vld [vmem:[%s1705_s4 + $0x148] sm:$0xff] }
  0x11   :  { %1809 = vst [vmem:[#allocation11_spill] sm:$0xff] %v864_v31  ;;  %268 = vmatpush.msra.mxu1 %v852_v29  ;;  %308 = vmatpush.msra.mxu3 %v864_v31  ;;  %v967_v48 = vld [vmem:[%s1705_s4 + $0x30] sm:$0xff]  ;;  %v979_v50 = vld [vmem:[%s1705_s4 + $0x38] sm:$0xff]  ;;  %v991_v52 = vld [vmem:[%s1705_s4 + $0x20] sm:$0xff] }
  0x12   :  { %1810 = vst [vmem:[#allocation12_spill] sm:$0xff] %v871_v32  ;;  %249 = vmatpush.msra.mxu0 %v871_v32  ;;  %289 = vmatpush.msra.mxu2 %v883_v34  ;;  %v972_v49 = vld [vmem:[%s1705_s4 + $0x130] sm:$0xff]  ;;  %v984_v51 = vld [vmem:[%s1705_s4 + $0x138] sm:$0xff]  ;;  %v996_v53 = vld [vmem:[%s1705_s4 + $0x120] sm:$0xff] }
  0x13   :  { %1811 = vst [vmem:[#allocation13_spill] sm:$0xff] %v876_v33  ;;  %269 = vmatpush.msra.mxu1 %v876_v33  ;;  %309 = vmatpush.msra.mxu3 %v888_v35  ;;  %v1003_v54 = vld [vmem:[%s1705_s4 + $0x28] sm:$0xff]  ;;  %v1015_v56 = vld [vmem:[%s1705_s4 + $0x10] sm:$0xff]  ;;  %v1027_v58 = vld [vmem:[%s1705_s4 + $0x18] sm:$0xff] }
  0x14   :  { %1812 = vst [vmem:[#allocation14_spill] sm:$0xff] %v883_v34  ;;  %250 = vmatpush.msra.mxu0 %v895_v36  ;;  %290 = vmatpush.msra.mxu2 %v907_v38  ;;  %v1008_v55 = vld [vmem:[%s1705_s4 + $0x128] sm:$0xff]  ;;  %v1020_v57 = vld [vmem:[%s1705_s4 + $0x110] sm:$0xff]  ;;  %v1032_v59 = vld [vmem:[%s1705_s4 + $0x118] sm:$0xff] }
  0x15   :  { %1813 = vst [vmem:[#allocation15_spill] sm:$0xff] %v888_v35  ;;  %270 = vmatpush.msra.mxu1 %v900_v37  ;;  %310 = vmatpush.msra.mxu3 %v912_v39  ;;  %v1039_v60 = vld [vmem:[%s1705_s4] sm:$0xff]  ;;  %v1051_v62 = vld [vmem:[%s1705_s4 + $0x8] sm:$0xff]  ;;  %v1236_v34 = vld [vmem:[%s1706_s5 + $0x90] sm:$0xff] }
  0x16   :  { %1814 = vst [vmem:[#allocation16_spill] sm:$0xff] %v895_v36  ;;  %251 = vmatpush.msra.mxu0 %v919_v40  ;;  %291 = vmatpush.msra.mxu2 %v931_v42  ;;  %v1044_v61 = vld [vmem:[%s1705_s4 + $0x100] sm:$0xff]  ;;  %v1056_v63 = vld [vmem:[%s1705_s4 + $0x108] sm:$0xff]  ;;  %v1241_v33 = vld [vmem:[%s1706_s5 + $0x190] sm:$0xff] }
  0x17   :  { %1815 = vst [vmem:[#allocation17_spill] sm:$0xff] %v900_v37  ;;  %271 = vmatpush.msra.mxu1 %v924_v41  ;;  %311 = vmatpush.msra.mxu3 %v936_v43  ;;  %v1223_v37 = vld [vmem:[%s1706_s5 + $0x1a8] sm:$0xff]  ;;  %v1252_v31 = vld [vmem:[%s1706_s5 + $0x98] sm:$0xff]  ;;  %v1271_v28 = vld [vmem:[%s1706_s5 + $0x180] sm:$0xff] }
  0x18   :  { %1816 = vst [vmem:[#allocation18_spill] sm:$0xff] %v907_v38  ;;  %252 = vmatpush.msra.mxu0 %v943_v44  ;;  %292 = vmatpush.msra.mxu2 %v955_v46  ;;  %v1204_v38 = vld [vmem:[%s1706_s5 + $0x1a0] sm:$0xff]  ;;  %v1257_v30 = vld [vmem:[%s1706_s5 + $0x198] sm:$0xff]  ;;  %v1296_v26 = vld [vmem:[%s1706_s5 + $0x170] sm:$0xff] }
  0x19   :  { %1817 = vst [vmem:[#allocation19_spill] sm:$0xff] %v912_v39  ;;  %272 = vmatpush.msra.mxu1 %v948_v45  ;;  %312 = vmatpush.msra.mxu3 %v960_v47  ;;  %v1199_v39 = vld [vmem:[%s1706_s5 + $0xa0] sm:$0xff]  ;;  %v1336_v24 = vld [vmem:[%s1706_s5 + $0x168] sm:$0xff]  ;;  %v1396_v22 = vld [vmem:[%s1706_s5 + $0x30] sm:$0xff] }
  0x1a   :  { %1818 = vst [vmem:[#allocation20_spill] sm:$0xff] %v919_v40  ;;  %253 = vmatpush.msra.mxu0 %v967_v48  ;;  %293 = vmatpush.msra.mxu2 %v979_v50  ;;  %v1185_v40 = vld [vmem:[%s1706_s5 + $0xb8] sm:$0xff]  ;;  %v1318_v25 = vld [vmem:[%s1706_s5 + $0x160] sm:$0xff] }
  0x1b   :  { %1819 = vst [vmem:[#allocation21_spill] sm:$0xff] %v924_v41  ;;  %273 = vmatpush.msra.mxu1 %v972_v49  ;;  %313 = vmatpush.msra.mxu3 %v984_v51  ;;  %v33_v41 = vld [vmem:[%s1710_s3] sm:$0xff] }
  0x1c   :  { %1820 = vst [vmem:[#allocation22_spill] sm:$0xff] %v931_v42  ;;  %254 = vmatpush.msra.mxu0 %v991_v52  ;;  %294 = vmatpush.msra.mxu2 %v1003_v54  ;;  %v32_v42 = vld [vmem:[%s1709_s1] sm:$0xff] }
  0x1d   :  { %1821 = vst [vmem:[#allocation23_spill] sm:$0xff] %v936_v43  ;;  %274 = vmatpush.msra.mxu1 %v996_v53  ;;  %314 = vmatpush.msra.mxu3 %v1008_v55 }
  0x1e   :  { %1822 = vst [vmem:[#allocation24_spill] sm:$0xff] %v943_v44  ;;  %255 = vmatpush.msra.mxu0 %v1015_v56  ;;  %295 = vmatpush.msra.mxu2 %v1027_v58  ;;  %v1170_v44 = vld [vmem:[%s1706_s5 + $0x1b0] sm:$0xff] }
  0x1f   :  { %1823 = vst [vmem:[#allocation25_spill] sm:$0xff] %v948_v45  ;;  %275 = vmatpush.msra.mxu1 %v1020_v57  ;;  %315 = vmatpush.msra.mxu3 %v1032_v59  ;;  %v30_v45 = vld [vmem:[%s1708_s2] sm:$0xff] }
  0x20   :  { %1824 = vst [vmem:[#allocation26_spill] sm:$0xff] %v955_v46  ;;  %256 = vmatpush.msra.mxu0 %v1039_v60  ;;  %296 = vmatpush.msra.mxu2 %v1051_v62  ;;  %v29_v46 = vld [vmem:[%s1707_s0] sm:$0xff] }
  0x21   :  { %1825 = vst [vmem:[#allocation27_spill] sm:$0xff] %v960_v47  ;;  %276 = vmatpush.msra.mxu1 %v1044_v61  ;;  %316 = vmatpush.msra.mxu3 %v1056_v63  ;;  %v1157_v47 = vld [vmem:[%s1706_s5 + $0xb0] sm:$0xff]  ;;  %v1172_v43 = vsub.f32 %v29_v46, %v30_v45  ;;  %v1190_v45 = vld [vmem:[%s1706_s5 + $0x1b8] sm:$0xff]  ;;  %v1192_v46 = vsub.f32 %v32_v42, %v33_v41  ;;  %v1218_v42 = vld [vmem:[%s1706_s5 + $0xa8] sm:$0xff] }
  0x22   :  { %1826 = vst [vmem:[#allocation28_spill] sm:$0xff] %v967_v48  ;;  %v1150_v48 = vld [vmem:[%s1706_s5 + $0x1c8] sm:$0xff] }
  0x23   :  { %1827 = vst [vmem:[#allocation29_spill] sm:$0xff] %v972_v49  ;;  %v1145_v49 = vld [vmem:[%s1706_s5 + $0xc8] sm:$0xff]  ;;  %v37_v41 = vmul.f32 %v1172_v43, %v1172_v43  ;;  %vm53_vm0 = vcmp.eq.f32.partialorder %v1172_v43, 0.0  ;;  %v38_v36 = vmul.f32 %v1192_v46, %v1192_v46 }
  0x24   :  { %1828 = vst [vmem:[#allocation30_spill] sm:$0xff] %v979_v50  ;;  %v1140_v50 = vld [vmem:[%s1706_s5 + $0x1c0] sm:$0xff]  ;;  %v54_v35 = vsel %vm53_vm0, 1.0, %v1172_v43 }
  0x25   :  { %1829 = vst [vmem:[#allocation31_spill] sm:$0xff] %v984_v51  ;;  %v1133_v51 = vld [vmem:[%s1706_s5 + $0xc0] sm:$0xff]  ;;  %v56_v32 = vand.u32 2147483647, %v54_v35  ;;  %v1259_v29 = vadd.f32 %v38_v36, %v37_v41  ;;  %v1278_v36 = vld [vmem:[%s1706_s5 + $0x88] sm:$0xff] }
  0x26   :  { %1830 = vst [vmem:[#allocation32_spill] sm:$0xff] %v991_v52  ;;  %v1128_v52 = vld [vmem:[%s1706_s5 + $0x1d8] sm:$0xff]  ;;  %v1266_v35 = vld [vmem:[%s1706_s5 + $0x80] sm:$0xff]  ;;  %v1283_v41 = vld [vmem:[%s1706_s5 + $0x188] sm:$0xff] }
  0x27   :  { %1831 = vst [vmem:[#allocation33_spill] sm:$0xff] %v996_v53  ;;  %v1123_v53 = vld [vmem:[%s1706_s5 + $0xd8] sm:$0xff]  ;;  %v57_v27 = vmax.f32 %v56_v32, 1e-30  ;;  %610 = vrsqrt.f32 %v1259_v29  ;;  %v1291_v32 = vld [vmem:[%s1706_s5 + $0x70] sm:$0xff]  ;;  %vm47_vm1 = vcmp.eq.f32.partialorder %v1259_v29, inf }
  0x28   :  { %1832 = vst [vmem:[#allocation34_spill] sm:$0xff] %v1003_v54  ;;  %v1116_v54 = vld [vmem:[%s1706_s5 + $0x1d0] sm:$0xff]  ;;  %vm49_vm2 = vcmp.eq.f32.partialorder %v1259_v29, 0.0 }
  0x29   :  { %1833 = vst [vmem:[#allocation35_spill] sm:$0xff] %v1008_v55  ;;  %v1111_v55 = vld [vmem:[%s1706_s5 + $0xd0] sm:$0xff]  ;;  %612 = vrcp.f32 %v57_v27 }
  0x2a   :  { %1834 = vst [vmem:[#allocation36_spill] sm:$0xff] %v1015_v56  ;;  %v1063_v56 = vld [vmem:[%s1706_s5 + $0xf0] sm:$0xff] }
  0x2b   :  { %1835 = vst [vmem:[#allocation37_spill] sm:$0xff] %v1020_v57  ;;  %v1068_v57 = vld [vmem:[%s1706_s5 + $0x1f0] sm:$0xff]  ;;  %327 = vmatpush.msrb.mxu0 %v1063_v56 }
  0x2c   :  { %1836 = vst [vmem:[#allocation38_spill] sm:$0xff] %v1027_v58  ;;  %v1075_v58 = vld [vmem:[%s1706_s5 + $0xf8] sm:$0xff]  ;;  %347 = vmatpush.msrb.mxu1 %v1068_v57 }
  0x2d   :  { %1837 = vst [vmem:[#allocation39_spill] sm:$0xff] %v1032_v59  ;;  %v1080_v59 = vld [vmem:[%s1706_s5 + $0x1f8] sm:$0xff]  ;;  %367 = vmatpush.msrb.mxu2 %v1075_v58 }
  0x2e   :  { %1838 = vst [vmem:[#allocation40_spill] sm:$0xff] %v1039_v60  ;;  %v1087_v60 = vld [vmem:[%s1706_s5 + $0xe0] sm:$0xff]  ;;  %387 = vmatpush.msrb.mxu3 %v1080_v59 }
  0x2f   :  { %1839 = vst [vmem:[#allocation41_spill] sm:$0xff] %v1044_v61  ;;  %v1092_v61 = vld [vmem:[%s1706_s5 + $0x1e0] sm:$0xff]  ;;  %328 = vmatpush.msrb.mxu0 %v1087_v60 }
  0x30   :  { %1840 = vst [vmem:[#allocation42_spill] sm:$0xff] %v1051_v62  ;;  %v1099_v62 = vld [vmem:[%s1706_s5 + $0xe8] sm:$0xff]  ;;  %348 = vmatpush.msrb.mxu1 %v1092_v61 }
  0x31   :  { %1841 = vst [vmem:[#allocation43_spill] sm:$0xff] %v1056_v63  ;;  %v1104_v63 = vld [vmem:[%s1706_s5 + $0x1e8] sm:$0xff]  ;;  %368 = vmatpush.msrb.mxu2 %v1099_v62  ;;  %329 = vmatpush.msrb.mxu0 %v1111_v55 }
  0x32   :  { %388 = vmatpush.msrb.mxu3 %v1104_v63  ;;  %349 = vmatpush.msrb.mxu1 %v1116_v54  ;;  %1842 = vst [vmem:[#allocation44_spill] sm:$0xff] %v1172_v43 }
  0x33   :  { %369 = vmatpush.msrb.mxu2 %v1123_v53  ;;  %330 = vmatpush.msrb.mxu0 %v1133_v51  ;;  %1843 = vst [vmem:[#allocation45_spill] sm:$0xff] %v1192_v46 }
  0x34   :  { %389 = vmatpush.msrb.mxu3 %v1128_v52  ;;  %350 = vmatpush.msrb.mxu1 %v1140_v50  ;;  %35 = vst [vmem:[%s1711_s6] sm:$0xff] %v1172_v43 }
  0x35   :  { %370 = vmatpush.msrb.mxu2 %v1145_v49  ;;  %331 = vmatpush.msrb.mxu0 %v1157_v47  ;;  %1844 = vst [vmem:[#allocation46_spill] sm:$0xff] %v1218_v42 }
  0x36   :  { %390 = vmatpush.msrb.mxu3 %v1150_v48  ;;  %351 = vmatpush.msrb.mxu1 %v1170_v44  ;;  %1845 = vst [vmem:[#allocation47_spill] sm:$0xff] %v1223_v37 }
  0x37   :  { %236 = vst [vmem:[#allocation1] ss:$2 sm:$0xff] %v1172_v43  ;;  %371 = vmatpush.msrb.mxu2 %v1185_v40  ;;  %332 = vmatpush.msrb.mxu0 %v1199_v39 }
  0x38   :  { %391 = vmatpush.msrb.mxu3 %v1190_v45  ;;  %1846 = vst [vmem:[#allocation48_spill] sm:$0xff] %v1236_v34  ;;  %352 = vmatpush.msrb.mxu1 %v1204_v38 }
  0x39   :  { %1847 = vst [vmem:[#allocation49_spill] sm:$0xff] %v1241_v33  ;;  %372 = vmatpush.msrb.mxu2 %v1218_v42  ;;  %333 = vmatpush.msrb.mxu0 %v1236_v34  ;;  %v1331_v34 = vld [vmem:[%s1706_s5 + $0x68] sm:$0xff] }
  0x3a   :  { %36 = vst [vmem:[%s1712_s7] sm:$0xff] %v1192_v46  ;;  %392 = vmatpush.msrb.mxu3 %v1223_v37  ;;  %353 = vmatpush.msrb.mxu1 %v1241_v33  ;;  %v1301_v33 = vld [vmem:[%s1706_s5 + $0x78] sm:$0xff] }
  0x3b   :  { %1848 = vst [vmem:[#allocation50_spill] sm:$0xff] %v1252_v31  ;;  %373 = vmatpush.msrb.mxu2 %v1252_v31  ;;  %334 = vmatpush.msrb.mxu0 %v1266_v35  ;;  %v1313_v31 = vld [vmem:[%s1706_s5 + $0x60] sm:$0xff] }
  0x3c   :  { %1849 = vst [vmem:[#allocation51_spill] sm:$0xff] %v1257_v30  ;;  %393 = vmatpush.msrb.mxu3 %v1257_v30  ;;  %354 = vmatpush.msrb.mxu1 %v1271_v28  ;;  %v1308_v30 = vld [vmem:[%s1706_s5 + $0x178] sm:$0xff] }
  0x3d   :  { %1850 = vst [vmem:[#allocation52_spill] sm:$0xff] %v1266_v35  ;;  %374 = vmatpush.msrb.mxu2 %v1278_v36  ;;  %335 = vmatpush.msrb.mxu0 %v1291_v32 }
  0x3e   :  { %1851 = vst [vmem:[#allocation53_spill] sm:$0xff] %v1271_v28  ;;  %394 = vmatpush.msrb.mxu3 %v1283_v41  ;;  %v1322_v28 = vld.sshfl [vmem:[#allocation1] sm:$0xff pattern:$0x75316420]  ;;  %355 = vmatpush.msrb.mxu1 %v1296_v26 }
  0x3f   :  { %1852 = vst [vmem:[#allocation54_spill] sm:$0xff] %v1278_v36  ;;  %v1324_v35 = vld.sshfl [vmem:[#allocation1 + $0x8] sm:$0xff pattern:$0x75316420]  ;;  %375 = vmatpush.msrb.mxu2 %v1301_v33  ;;  %336 = vmatpush.msrb.mxu0 %v1313_v31 }
  0x40   :  { %1853 = vst [vmem:[#allocation55_spill] sm:$0xff] %v1283_v41  ;;  %395 = vmatpush.msrb.mxu3 %v1308_v30  ;;  %v611_v41 = vpop.eup %610  ;;  %356 = vmatpush.msrb.mxu1 %v1318_v25 }
  0x41   :  { %1854 = vst [vmem:[#allocation56_spill] sm:$0xff] %v1291_v32  ;;  %v1349_v32 = vld [vmem:[%s1706_s5 + $0x150] sm:$0xff]  ;;  %v613_v36 = vpop.eup %612  ;;  %376 = vmatpush.msrb.mxu2 %v1331_v34  ;;  %v41_v37 = vmul.f32 %v611_v41, %v1259_v29  ;;  %317 = vmatmul.f32.vlgmr.msra.gmra.mxu3 %v1324_v35 }
  0x42   :  { %1855 = vst [vmem:[#allocation57_spill] sm:$0xff] %v1296_v26  ;;  %v1344_v26 = vld [vmem:[%s1706_s5 + $0x50] sm:$0xff]  ;;  %396 = vmatpush.msrb.mxu3 %v1336_v24  ;;  %357 = vmatpush.msrb.mxu1 %v1349_v32  ;;  %v59_v23 = vmul.f32 %v613_v36, %v57_v27 }
  0x43   :  { %1856 = vst [vmem:[#allocation58_spill] sm:$0xff] %v1301_v33  ;;  %v1356_v33 = vld [vmem:[%s1706_s5 + $0x58] sm:$0xff]  ;;  %337 = vmatpush.msrb.mxu0 %v1344_v26  ;;  %v42_v42 = vmul.f32 %v611_v41, %v41_v37  ;;  %v1401_v27 = vld [vmem:[%s1706_s5 + $0x130] sm:$0xff]  ;;  %297 = vmatmul.f32.vlgmr.msra.gmra.mxu2 %v1322_v28 }
  0x44   :  { %1857 = vst [vmem:[#allocation59_spill] sm:$0xff] %v1308_v30  ;;  %v1361_v30 = vld [vmem:[%s1706_s5 + $0x158] sm:$0xff]  ;;  %377 = vmatpush.msrb.mxu2 %v1356_v33  ;;  %257 = vmatmul.f32.vlgmr.msra.gmra.mxu0 %v1322_v28  ;;  %v434_v28 = vadd.f32 %v1123_v53, %v739_v10  ;;  %v464_v10 = vadd.f32 %v1150_v48, %v768_v15 }
  0x45   :  { %1858 = vst [vmem:[#allocation60_spill] sm:$0xff] %v1313_v31  ;;  %v1368_v31 = vld [vmem:[%s1706_s5 + $0x40] sm:$0xff]  ;;  %397 = vmatpush.msrb.mxu3 %v1361_v30  ;;  %v43_v37 = vmul.f32 0.5, %v42_v42  ;;  %277 = vmatmul.f32.vlgmr.msra.gmra.mxu1 %v1324_v35  ;;  %v462_v15 = vadd.f32 %v1190_v45, %v792_v19  ;;  %v427_v48 = vadd.f32 %v1199_v39, %v799_v20  ;;  %v1883_v20 = vld [vmem:[#allocation2_spill] sm:$0xff]  ;;  %v1888_v53 = vld [vmem:[#allocation48_spill] sm:$0xff] }
  0x46   :  { %1859 = vst [vmem:[#allocation61_spill] sm:$0xff] %v1318_v25  ;;  %v1373_v25 = vld [vmem:[%s1706_s5 + $0x140] sm:$0xff]  ;;  %338 = vmatpush.msrb.mxu0 %v1368_v31  ;;  %v1884_v39 = vld [vmem:[#allocation46_spill] sm:$0xff]  ;;  %v1897_v35 = vld [vmem:[#allocation8_spill] sm:$0xff] }
  0x47   :  { %1860 = vst [vmem:[#allocation62_spill] sm:$0xff] %v1331_v34  ;;  %v1386_v34 = vld [vmem:[%s1706_s5 + $0x148] sm:$0xff]  ;;  %358 = vmatpush.msrb.mxu1 %v1373_v25  ;;  %v1422_v42 = vld [vmem:[%s1706_s5 + $0x20] sm:$0xff] }
  0x48   :  { %1861 = vst [vmem:[#allocation63_spill] sm:$0xff] %v1336_v24  ;;  %v1381_v24 = vld [vmem:[%s1706_s5 + $0x48] sm:$0xff]  ;;  %398 = vmatpush.msrb.mxu3 %v1386_v34  ;;  %339 = vmatpush.msrb.mxu0 %v1396_v22 }
  0x49   :  { %322 = vst [vmem:[#allocation1] ss:$2 sm:$0xff] %v1192_v46  ;;  %378 = vmatpush.msrb.mxu2 %v1381_v24  ;;  %359 = vmatpush.msrb.mxu1 %v1401_v27 }
  0x4a   :  { %1862 = vst [vmem:[#allocation64_spill] sm:$0xff] %v1344_v26  ;;  %v60_v26 = vsub.f32 2.0, %v59_v23  ;;  %v1413_v23 = vld [vmem:[%s1706_s5 + $0x138] sm:$0xff]  ;;  %340 = vmatpush.msrb.mxu0 %v1422_v42 }
  0x4b   :  { %1863 = vst [vmem:[#allocation65_spill] sm:$0xff] %v1349_v32  ;;  %v55_v32 = vand.u32 2147483647, %v1192_v46  ;;  %399 = vmatpush.msrb.mxu3 %v1413_v23 }
  0x4c   :  { %1864 = vst [vmem:[#allocation66_spill] sm:$0xff] %v1356_v33  ;;  %v44_v33 = vsub.f32 1.5, %v43_v37  ;;  %v1450_v37 = vld [vmem:[%s1706_s5 + $0x10] sm:$0xff] }
  0x4d   :  { %1865 = vst [vmem:[#allocation67_spill] sm:$0xff] %v1361_v30  ;;  %v61_v30 = vmul.f32 %v613_v36, %v60_v26  ;;  %v1436_v26 = vld [vmem:[%s1706_s5 + $0x28] sm:$0xff]  ;;  %341 = vmatpush.msrb.mxu0 %v1450_v37 }
  0x4e   :  { %1866 = vst [vmem:[#allocation68_spill] sm:$0xff] %v1368_v31  ;;  %v471_v31 = vadd.f32 %v1192_v46, %v1172_v43  ;;  %v1441_v36 = vld [vmem:[%s1706_s5 + $0x128] sm:$0xff] }
  0x4f   :  { %1867 = vst [vmem:[#allocation69_spill] sm:$0xff] %v1373_v25  ;;  %v1408_v25 = vld [vmem:[%s1706_s5 + $0x38] sm:$0xff]  ;;  %v62_v46 = vmul.f32 %v61_v30, %v55_v32  ;;  %400 = vmatpush.msrb.mxu3 %v1441_v36 }
  0x50   :  { %1868 = vst [vmem:[#allocation70_spill] sm:$0xff] %v1381_v24  ;;  %v1429_v24 = vld.sshfl [vmem:[#allocation1] sm:$0xff pattern:$0x75316420]  ;;  %379 = vmatpush.msrb.mxu2 %v1408_v25  ;;  %v1462_v30 = vld [vmem:[%s1706_s5 + $0x18] sm:$0xff] }
  0x51   :  { %1869 = vst [vmem:[#allocation71_spill] sm:$0xff] %v1386_v34  ;;  %v1427_v34 = vld [vmem:[%s1706_s5 + $0x120] sm:$0xff]  ;;  %v1443_v43 = vld.sshfl [vmem:[#allocation1 + $0x8] sm:$0xff pattern:$0x75316420]  ;;  %v1467_v32 = vld [vmem:[%s1706_s5 + $0x118] sm:$0xff] }
  0x52   :  { %1870 = vst [vmem:[#allocation72_spill] sm:$0xff] %v1396_v22  ;;  %v45_v22 = vmul.f32 %v611_v41, %v44_v33  ;;  %360 = vmatpush.msrb.mxu1 %v1427_v34  ;;  %380 = vmatpush.msrb.mxu2 %v1436_v26  ;;  %v1478_v33 = vld [vmem:[%s1706_s5] sm:$0xff] }
  0x53   :  { %1871 = vst [vmem:[#allocation73_spill] sm:$0xff] %v1401_v27  ;;  %v1455_v27 = vld [vmem:[%s1706_s5 + $0x110] sm:$0xff]  ;;  %v1483_v41 = vld [vmem:[%s1706_s5 + $0x100] sm:$0xff]  ;;  %401 = vmatpush.msrb.mxu3 %v1467_v32  ;;  %342 = vmatpush.msrb.mxu0 %v1478_v33 }
  0x54   :  { %1872 = vst [vmem:[#allocation74_spill] sm:$0xff] %v1413_v23  ;;  %v50_v23 = vand.u32 2147483648, %v1259_v29  ;;  %361 = vmatpush.msrb.mxu1 %v1455_v27  ;;  %381 = vmatpush.msrb.mxu2 %v1462_v30 }
  0x55   :  { %1873 = vst [vmem:[#allocation75_spill] sm:$0xff] %v1422_v42  ;;  %343 = vmatmul.f32.vlgmr.msrb.gmra.mxu0 %v1429_v24 }
  0x56   :  { %1874 = vst [vmem:[#allocation76_spill] sm:$0xff] %v1427_v34  ;;  %v46_v34 = vmul.f32 %v45_v22, %v1259_v29  ;;  %v437_v22 = vadd.f32 %v1063_v56, %v683_v0  ;;  %362 = vmatpush.msrb.mxu1 %v1483_v41  ;;  %v1890_v56 = vld [vmem:[#allocation49_spill] sm:$0xff] }
  0x57   :  { %1875 = vst [vmem:[#allocation77_spill] sm:$0xff] %v1436_v26  ;;  %363 = vmatmul.f32.vlgmr.msrb.gmra.mxu1 %v1443_v43 }
  0x58   :  { %1876 = vst [vmem:[#allocation78_spill] sm:$0xff] %v1441_v36  ;;  %v1497_v36 = vld [vmem:[%s1706_s5 + $0x108] sm:$0xff]  ;;  %478 = vmatpush.msra.mxu0 %v437_v22 }
  0x59   :  { %1877 = vst [vmem:[#allocation79_spill] sm:$0xff] %v1450_v37  ;;  %v48_v37 = vsel %vm47_vm1, %v1259_v29, %v46_v34  ;;  %402 = vmatpush.msrb.mxu3 %v1497_v36  ;;  %v467_v34 = vadd.f32 %v1092_v61, %v710_v5  ;;  %v465_v5 = vadd.f32 %v1116_v54, %v734_v9  ;;  %v1902_v22 = vld [vmem:[#allocation54_spill] sm:$0xff] }
  0x5a   :  { %1878 = vst [vmem:[#allocation80_spill] sm:$0xff] %v1455_v27  ;;  %v469_v27 = vadd.f32 %v1068_v57, %v688_v1  ;;  %v51_v0 = vsel %vm49_vm2, %v50_v23, %v48_v37  ;;  %v435_v1 = vadd.f32 %v1087_v60, %v705_v4  ;;  %403 = vmatmul.f32.vlgmr.msrb.gmra.mxu3 %v1443_v43  ;;  %v1892_v60 = vld [vmem:[#allocation50_spill] sm:$0xff] }
  0x5b   :  { %473 = vst [vmem:[#allocation1] ss:$2 sm:$0xff] %v471_v31  ;;  %v1471_v31 = vmin.f32 %v62_v46, 1e+30  ;;  %v1492_v46 = vld [vmem:[%s1706_s5 + $0x8] sm:$0xff]  ;;  %v433_v4 = vadd.f32 %v1111_v55, %v727_v8  ;;  %v463_v29 = vadd.f32 %v1140_v50, %v756_v13  ;;  %v432_v9 = vadd.f32 %v1145_v49, %v763_v14  ;;  %v1889_v55 = vld [vmem:[#allocation5_spill] sm:$0xff] }
  0x5c   :  { %1879 = vst [vmem:[#allocation81_spill] sm:$0xff] %v1462_v30  ;;  %v438_v30 = vadd.f32 %v1075_v58, %v693_v2  ;;  %382 = vmatpush.msrb.mxu2 %v1492_v46  ;;  %v436_v2 = vadd.f32 %v1099_v62, %v717_v6  ;;  %498 = vmatpush.msra.mxu1 %v469_v27  ;;  %v1893_v62 = vld [vmem:[#allocation7_spill] sm:$0xff]  ;;  %v1898_v27 = vld [vmem:[#allocation52_spill] sm:$0xff] }
  0x5d   :  { %1880 = vst [vmem:[#allocation82_spill] sm:$0xff] %v1467_v32  ;;  %v68_v26 = vmax.f32 %v1471_v31, 1e-30  ;;  %v73_v42 = vadd.f32 1.0, %v1471_v31  ;;  %v470_v32 = vadd.f32 %v1080_v59, %v700_v3  ;;  %v468_v3 = vadd.f32 %v1104_v63, %v722_v7  ;;  %383 = vmatmul.f32.vlgmr.msrb.gmra.mxu2 %v1429_v24  ;;  %479 = vmatpush.msra.mxu0 %v435_v1  ;;  %v1891_v59 = vld [vmem:[#allocation6_spill] sm:$0xff]  ;;  %v1894_v63 = vld [vmem:[#allocation51_spill] sm:$0xff] }
  0x5e   :  { %52 = vst [vmem:[%s1713_s8] sm:$0xff] %v51_v0  ;;  %v466_v6 = vadd.f32 %v1128_v52, %v744_v11  ;;  %518 = vmatpush.msra.mxu2 %v438_v30  ;;  %v431_v7 = vadd.f32 %v1133_v51, %v751_v12  ;;  %499 = vmatpush.msra.mxu1 %v467_v34  ;;  %vm64_vm3 = vcmp.gt.f32.partialorder %v1471_v31, 2.4142137  ;;  %vm65_vm4 = vcmp.gt.f32.partialorder %v1471_v31, 0.41421357  ;;  %v1887_v51 = vld [vmem:[#allocation4_spill] sm:$0xff]  ;;  %v1903_v1 = vld [vmem:[#allocation11_spill] sm:$0xff] }
  0x5f   :  { %614 = vrcp.f32 %v68_v26  ;;  %538 = vmatpush.msra.mxu3 %v470_v32  ;;  %480 = vmatpush.msra.mxu0 %v433_v4  ;;  %v429_v12 = vadd.f32 %v1157_v47, %v775_v16  ;;  %v461_v13 = vadd.f32 %v1170_v44, %v780_v17  ;;  %v430_v14 = vadd.f32 %v1185_v40, %v787_v18  ;;  %vm1567_vm6 = vmxor %vm64_vm3, %vm618_vm5  ;;  %v1885_v44 = vld [vmem:[#allocation3_spill] sm:$0xff]  ;;  %v1901_v32 = vld [vmem:[#allocation10_spill] sm:$0xff] }
  0x60   :  { %616 = vrcp.f32 %v73_v42  ;;  %519 = vmatpush.msra.mxu2 %v436_v2  ;;  %500 = vmatpush.msra.mxu1 %v465_v5  ;;  %v459_v16 = vadd.f32 %v1204_v38, %v804_v21  ;;  %v605_v19 = vadd.f32 -1.0, %v1471_v31  ;;  %v428_v40 = vadd.f32 %v1884_v39, %v1883_v20  ;;  %v1886_v47 = vld [vmem:[#allocation47_spill] sm:$0xff]  ;;  %vm1590_vm7 = vmand %vm65_vm4, %vm1567_vm6  ;;  %v1906_v4 = vld [vmem:[#allocation56_spill] sm:$0xff] }
  0x61   :  { %539 = vmatpush.msra.mxu3 %v468_v3  ;;  %481 = vmatpush.msra.mxu0 %v431_v7  ;;  %v460_v21 = vadd.f32 %v1886_v47, %v1885_v44  ;;  %v425_v54 = vadd.f32 %v1888_v53, %v1887_v51  ;;  %v457_v57 = vadd.f32 %v1890_v56, %v1889_v55  ;;  %v1904_v34 = vld [vmem:[#allocation55_spill] sm:$0xff]  ;;  %v1905_v3 = vld [vmem:[#allocation12_spill] sm:$0xff]  ;;  %v1923_v51 = vld [vmem:[#allocation21_spill] sm:$0xff] }
  0x62   :  { %520 = vmatpush.msra.mxu2 %v434_v28  ;;  %501 = vmatpush.msra.mxu1 %v463_v29  ;;  %v426_v61 = vadd.f32 %v1892_v60, %v1891_v59  ;;  %v458_v45 = vadd.f32 %v1894_v63, %v1893_v62  ;;  %v423_v23 = vadd.f32 %v1898_v27, %v1897_v35  ;;  %v1907_v28 = vld [vmem:[#allocation13_spill] sm:$0xff]  ;;  %v1919_v39 = vld [vmem:[#allocation19_spill] sm:$0xff]  ;;  %v1921_v47 = vld [vmem:[#allocation20_spill] sm:$0xff] }
  0x63   :  { %540 = vmatpush.msra.mxu3 %v466_v6  ;;  %482 = vmatpush.msra.mxu0 %v429_v12  ;;  %v424_v0 = vadd.f32 %v1902_v22, %v1901_v32  ;;  %v456_v2 = vadd.f32 %v1904_v34, %v1903_v1  ;;  %v421_v5 = vadd.f32 %v1906_v4, %v1905_v3  ;;  %v1908_v6 = vld [vmem:[#allocation57_spill] sm:$0xff]  ;;  %v1925_v56 = vld [vmem:[#allocation22_spill] sm:$0xff]  ;;  %v1927_v59 = vld [vmem:[#allocation23_spill] sm:$0xff] }
  0x64   :  { %521 = vmatpush.msra.mxu2 %v432_v9  ;;  %502 = vmatpush.msra.mxu1 %v461_v13  ;;  %v453_v7 = vadd.f32 %v1908_v6, %v1907_v28  ;;  %v1910_v9 = vld [vmem:[#allocation58_spill] sm:$0xff]  ;;  %v1924_v53 = vld [vmem:[#allocation65_spill] sm:$0xff]  ;;  %v1928_v60 = vld [vmem:[#allocation67_spill] sm:$0xff] }
  0x65   :  { %v615_v8 = vpop.eup %614  ;;  %541 = vmatpush.msra.mxu3 %v464_v10  ;;  %483 = vmatpush.msra.mxu0 %v427_v48  ;;  %v1915_v48 = vld [vmem:[#allocation17_spill] sm:$0xff]  ;;  %v1929_v62 = vld [vmem:[#allocation24_spill] sm:$0xff]  ;;  %v1936_v32 = vld [vmem:[#allocation71_spill] sm:$0xff] }
  0x66   :  { %v617_v11 = vpop.eup %616  ;;  %v70_v52 = vmul.f32 %v615_v8, %v68_v26  ;;  %522 = vmatpush.msra.mxu2 %v430_v14  ;;  %v1900_v26 = vld [vmem:[#allocation53_spill] sm:$0xff]  ;;  %503 = vmatpush.msra.mxu1 %v459_v16  ;;  %v1914_v14 = vld [vmem:[#allocation60_spill] sm:$0xff]  ;;  %v1941_v28 = vld [vmem:[#allocation30_spill] sm:$0xff] }
  0x67   :  { %v75_v50 = vmul.f32 %v617_v11, %v73_v42  ;;  %542 = vmatpush.msra.mxu3 %v462_v15  ;;  %v1899_v42 = vld [vmem:[#allocation9_spill] sm:$0xff]  ;;  %484 = vmatpush.msra.mxu0 %v425_v54  ;;  %v449_v54 = vadd.f32 %v1924_v53, %v1923_v51  ;;  %v1930_v63 = vld [vmem:[#allocation68_spill] sm:$0xff]  ;;  %v414_v6 = vadd.f32 %v1408_v25, %v1941_v28  ;;  %v1956_v53 = vld [vmem:[#allocation38_spill] sm:$0xff] }
  0x68   :  { %v71_v49 = vsub.f32 2.0, %v70_v52  ;;  %v455_v37 = vadd.f32 %v1900_v26, %v1899_v42  ;;  %523 = vmatpush.msra.mxu2 %v428_v40  ;;  %504 = vmatpush.msra.mxu1 %v457_v57  ;;  %v1912_v52 = vld [vmem:[#allocation59_spill] sm:$0xff]  ;;  %v1926_v57 = vld [vmem:[#allocation66_spill] sm:$0xff]  ;;  %v1932_v35 = vld [vmem:[#allocation69_spill] sm:$0xff] }
  0x69   :  { %v76_v18 = vsub.f32 2.0, %v75_v50  ;;  %543 = vmatpush.msra.mxu3 %v460_v21  ;;  %v1913_v50 = vld [vmem:[#allocation16_spill] sm:$0xff]  ;;  %485 = vmatpush.msra.mxu0 %v423_v23  ;;  %v1920_v40 = vld [vmem:[#allocation63_spill] sm:$0xff]  ;;  %v1933_v42 = vld [vmem:[#allocation26_spill] sm:$0xff] }
  0x6a   :  { %v72_v38 = vmul.f32 %v615_v8, %v71_v49  ;;  %v1909_v8 = vld [vmem:[#allocation14_spill] sm:$0xff]  ;;  %524 = vmatpush.msra.mxu2 %v426_v61  ;;  %v419_v15 = vadd.f32 %v1914_v14, %v1913_v50  ;;  %v1916_v49 = vld [vmem:[#allocation61_spill] sm:$0xff]  ;;  %505 = vmatpush.msra.mxu1 %v455_v37  ;;  %v452_v44 = vadd.f32 %v1920_v40, %v1919_v39  ;;  %v1922_v21 = vld [vmem:[#allocation64_spill] sm:$0xff] }
  0x6b   :  { %v77_v58 = vmul.f32 %v617_v11, %v76_v18  ;;  %v422_v10 = vadd.f32 %v1910_v9, %v1909_v8  ;;  %v1911_v11 = vld [vmem:[#allocation15_spill] sm:$0xff]  ;;  %544 = vmatpush.msra.mxu3 %v458_v45  ;;  %v451_v16 = vadd.f32 %v1916_v49, %v1915_v48  ;;  %v1917_v18 = vld [vmem:[#allocation18_spill] sm:$0xff]  ;;  %486 = vmatpush.msra.mxu0 %v421_v5  ;;  %v1937_v1 = vld [vmem:[#allocation28_spill] sm:$0xff] }
  0x6c   :  { %v78_v43 = vsub.f32 0.0, %v72_v38  ;;  %v454_v12 = vadd.f32 %v1912_v52, %v1911_v11  ;;  %525 = vmatpush.msra.mxu2 %v424_v0  ;;  %v417_v38 = vadd.f32 %v1922_v21, %v1921_v47  ;;  %506 = vmatpush.msra.mxu1 %v453_v7  ;;  %v450_v61 = vadd.f32 %v1928_v60, %v1927_v59  ;;  %v1934_v26 = vld [vmem:[#allocation70_spill] sm:$0xff]  ;;  %v1938_v34 = vld [vmem:[#allocation72_spill] sm:$0xff]  ;;  %v1939_v3 = vld [vmem:[#allocation29_spill] sm:$0xff] }
  0x6d   :  { %v80_v30 = vmul.f32 %v605_v19, %v77_v58  ;;  %v1918_v19 = vld [vmem:[#allocation62_spill] sm:$0xff]  ;;  %545 = vmatpush.msra.mxu3 %v456_v2  ;;  %v418_v58 = vadd.f32 %v1926_v57, %v1925_v56  ;;  %v415_v45 = vadd.f32 %v1930_v63, %v1929_v62  ;;  %487 = vmatpush.msra.mxu0 %v419_v15  ;;  %v1940_v4 = vld [vmem:[#allocation73_spill] sm:$0xff]  ;;  %v1942_v7 = vld [vmem:[#allocation31_spill] sm:$0xff] }
  0x6e   :  { %v420_v20 = vadd.f32 %v1918_v19, %v1917_v18  ;;  %526 = vmatpush.msra.mxu2 %v422_v10  ;;  %507 = vmatpush.msra.mxu1 %v451_v16  ;;  %v416_v37 = vadd.f32 %v1934_v26, %v1933_v42  ;;  %v413_v2 = vadd.f32 %v1938_v34, %v1937_v1  ;;  %v1944_v10 = vld [vmem:[#allocation32_spill] sm:$0xff]  ;;  %v1945_v11 = vld [vmem:[#allocation75_spill] sm:$0xff]  ;;  %v1948_v15 = vld [vmem:[#allocation34_spill] sm:$0xff] }
  0x6f   :  { %v81_v29 = vsel %vm1590_vm7, %v80_v30, %v1471_v31  ;;  %546 = vmatpush.msra.mxu3 %v454_v12  ;;  %v1935_v30 = vld [vmem:[#allocation27_spill] sm:$0xff]  ;;  %v445_v5 = vadd.f32 %v1940_v4, %v1939_v3  ;;  %488 = vmatpush.msra.mxu0 %v417_v38  ;;  %v411_v52 = vadd.f32 %v1945_v11, %v1944_v10  ;;  %v1946_v12 = vld [vmem:[#allocation33_spill] sm:$0xff]  ;;  %v1947_v50 = vld [vmem:[#allocation76_spill] sm:$0xff]  ;;  %v619_v38 = vmov 0.0  }
  0x70   :  { %v1615_v13 = vsel %vm64_vm3, %v78_v43, %v81_v29  ;;  %v1931_v43 = vld [vmem:[#allocation25_spill] sm:$0xff]  ;;  %v448_v22 = vadd.f32 %v1936_v32, %v1935_v30  ;;  %527 = vmatpush.msra.mxu2 %v420_v20  ;;  %508 = vmatpush.msra.mxu1 %v449_v54  ;;  %v1943_v29 = vld [vmem:[#allocation74_spill] sm:$0xff]  ;;  %v443_v14 = vadd.f32 %v1947_v50, %v1946_v12  ;;  %v1950_v16 = vld [vmem:[#allocation35_spill] sm:$0xff]  ;;  %v83_v51 = vsel %vm1590_vm7, 0.7853982, %v619_v38 }
  0x71   :  { %v1623_v17 = vmul.f32 %v1615_v13, %v1615_v13  ;;  %v447_v27 = vadd.f32 %v1932_v35, %v1931_v43  ;;  %547 = vmatpush.msra.mxu3 %v452_v44  ;;  %v446_v8 = vadd.f32 %v1943_v29, %v1942_v7  ;;  %489 = vmatpush.msra.mxu0 %v415_v45  ;;  %v1949_v48 = vld [vmem:[#allocation77_spill] sm:$0xff]  ;;  %v1951_v18 = vld [vmem:[#allocation78_spill] sm:$0xff]  ;;  %v1952_v20 = vld [vmem:[#allocation36_spill] sm:$0xff] }
  0x72   :  { %528 = vmatpush.msra.mxu2 %v418_v58  ;;  %v412_v49 = vadd.f32 %v1949_v48, %v1948_v15  ;;  %v444_v25 = vadd.f32 %v1951_v18, %v1950_v16  ;;  %v1953_v39 = vld [vmem:[#allocation79_spill] sm:$0xff]  ;;  %v1954_v44 = vld [vmem:[#allocation37_spill] sm:$0xff]  ;;  %v1955_v47 = vld [vmem:[#allocation80_spill] sm:$0xff] }
  0x73   :  { %v86_v55 = vmul.f32 0.080537446, %v1623_v17  ;;  %548 = vmatpush.msra.mxu3 %v450_v61  ;;  %509 = vmatpush.msra.mxu1 %v447_v27  ;;  %v409_v40 = vadd.f32 %v1953_v39, %v1952_v20  ;;  %v441_v21 = vadd.f32 %v1955_v47, %v1954_v44  ;;  %v1957_v54 = vld [vmem:[#allocation81_spill] sm:$0xff]  ;;  %v1958_v56 = vld [vmem:[#allocation39_spill] sm:$0xff]  ;;  %v1959_v57 = vld [vmem:[#allocation82_spill] sm:$0xff] }
  0x74   :  { %529 = vmatpush.msra.mxu2 %v416_v37  ;;  %490 = vmatpush.msra.mxu0 %v413_v2  ;;  %v442_v58 = vadd.f32 %v1959_v57, %v1958_v56  ;;  %v1960_v60 = vld [vmem:[#allocation40_spill] sm:$0xff]  ;;  %v1961_v62 = vld [vmem:[#allocation41_spill] sm:$0xff]  ;;  %v1962_v45 = vld [vmem:[#allocation42_spill] sm:$0xff]  ;;  %v84_v27 = vsel %vm64_vm3, 1.5707964, %v83_v51 }
  0x75   :  { %v606_v23 = vadd.f32 -0.13877685, %v86_v55  ;;  %549 = vmatpush.msra.mxu3 %v448_v22  ;;  %510 = vmatpush.msra.mxu1 %v445_v5  ;;  %v410_v55 = vadd.f32 %v1957_v54, %v1956_v53  ;;  %v407_v61 = vadd.f32 %v1478_v33, %v1960_v60  ;;  %v439_v63 = vadd.f32 %v1483_v41, %v1961_v62  ;;  %v1963_v43 = vld [vmem:[#allocation43_spill] sm:$0xff]  ;;  %v474_v33 = vld.sshfl [vmem:[#allocation1] sm:$0xff pattern:$0x75316420] }
  0x76   :  { %530 = vmatpush.msra.mxu2 %v414_v6  ;;  %491 = vmatpush.msra.mxu0 %v411_v52  ;;  %v408_v24 = vadd.f32 %v1492_v46, %v1962_v45  ;;  %v440_v35 = vadd.f32 %v1497_v36, %v1963_v43  ;;  %v475_v41 = vld.sshfl [vmem:[#allocation1 + $0x8] sm:$0xff pattern:$0x75316420]  ;;  %v1964_v46 = vld [vmem:[#allocation45_spill] sm:$0xff] }
  0x77   :  { %v88_v0 = vmul.f32 %v606_v23, %v1623_v17  ;;  %550 = vmatpush.msra.mxu3 %v446_v8  ;;  %511 = vmatpush.msra.mxu1 %v443_v14  ;;  %vm100_vm8 = vcmp.eq.f32.partialorder %v1964_v46, 0.0  ;;  %vm103_vm11 = vcmp.lt.f32.partialorder %v1964_v46, 0.0 }
  0x78   :  { %531 = vmatpush.msra.mxu2 %v412_v49  ;;  %492 = vmatpush.msra.mxu0 %v409_v40  ;;  %vm101_vm10 = vmand %vm53_vm0, %vm100_vm8 }
  0x79   :  { %v89_v9 = vadd.f32 0.19977711, %v88_v0  ;;  %551 = vmatpush.msra.mxu3 %v444_v25  ;;  %512 = vmatpush.msra.mxu1 %v441_v21 }
  0x7a   :  { %532 = vmatpush.msra.mxu2 %v410_v55  ;;  %493 = vmatpush.msra.mxu0 %v407_v61 }
  0x7b   :  { %v90_v19 = vmul.f32 %v89_v9, %v1623_v17  ;;  %552 = vmatpush.msra.mxu3 %v442_v58  ;;  %513 = vmatpush.msra.mxu1 %v439_v63 }
  0x7c   :  { %533 = vmatpush.msra.mxu2 %v408_v24  ;;  %494 = vmatmul.f32.vlgmr.msra.gmra.mxu0 %v474_v33 }
  0x7d   :  { %v607_v59 = vadd.f32 -0.3333295, %v90_v19  ;;  %553 = vmatpush.msra.mxu3 %v440_v35  ;;  %514 = vmatmul.f32.vlgmr.msra.gmra.mxu1 %v475_v41 }
  0x7e   :  { %534 = vmatmul.f32.vlgmr.msra.gmra.mxu2 %v474_v33  ;;  %554 = vmatmul.f32.vlgmr.msra.gmra.mxu3 %v475_v41 }
  0x7f   :  { %v92_v23 = vmul.f32 %v607_v59, %v1623_v17  ;;  %v1965_v17 = vld [vmem:[#allocation44_spill] sm:$0xff] }
  0x80   :  { %vm96_vm9 = vcmp.gt.f32.partialorder %v1965_v17, 0.0 }
  0x81   :  { %v93_v42 = vmul.f32 %v92_v23, %v1615_v13 }
  0x83   :  { %v94_v36 = vadd.f32 %v93_v42, %v84_v27 }
  0x85   :  { %v95_v31 = vadd.f32 %v94_v36, %v1615_v13 }
  0x87   :  { %v97_v26 = vsub.f32 3.1415927, %v95_v31 }
  0x89   :  { %v98_v37 = vsel %vm96_vm9, %v95_v31, %v97_v26 }
  0x8a   :  { %v99_v30 = vsel %vm53_vm0, 1.5707964, %v98_v37 }
  0x8b   :  { %v102_v32 = vsel %vm101_vm10, 0.0, %v99_v30 }
  0x8c   :  { %v104_v22 = vsub.f32 0.0, %v102_v32 }
  0x8e   :  { %v105_v0 = vsel %vm103_vm11, %v104_v22, %v102_v32 }
  0x8f   :  { %106 = vst [vmem:[%s1714_s9] sm:$0xff] %v105_v0 }
  0xc1   :  { %v258_v34 = vpop.f32.mrf.mxu0 }
  0xc2   :  { %v278_v2 = vpop.f32.mrf.mxu1 }
  0xc3   :  { %v279_v6 = vadd.f32 %v278_v2, %v258_v34 }
  0xc4   :  { %v318_v1 = vpop.f32.mrf.mxu3 }
  0xc6   :  { %v298_v13 = vpop.f32.mrf.mxu2 }
  0xc7   :  { %v319_v3 = vadd.f32 %v318_v1, %v298_v13 }
  0xd2   :  { %v344_v29 = vpop.f32.mrf.mxu0 }
  0xd4   :  { %v364_v8 = vpop.f32.mrf.mxu1 }
  0xd5   :  { %v365_v9 = vadd.f32 %v364_v8, %v344_v29 }
  0xd7   :  { %v562_v11 = vsub.f32 %v279_v6, %v365_v9 }
  0xd9   :  { %v564_v12 = vmul.f32 40000.0, %v562_v11 }
  0xdd   :  { %v404_v5 = vpop.f32.mrf.mxu3 }
  0xe0   :  { %v384_v4 = vpop.f32.mrf.mxu2 }
  0xe1   :  { %v405_v28 = vadd.f32 %v404_v5, %v384_v4 }
  0xe3   :  { %v563_v7 = vsub.f32 %v319_v3, %v405_v28 }
  0xe5   :  { %v565_v10 = vmul.f32 40000.0, %v563_v7 }
  0xe7   :  { %v568_v52 = vrot.slane %v565_v10, 4 }
  0xe9   :  { %v570_v50 = vsel %vm569_vm12, %v564_v12, %v568_v52 }
  0xea   :  { %572 = vst [vmem:[%s1715_s10] sm:$0xff] %v570_v50 }
  0xf9   :  { %v495_v14 = vpop.f32.mrf.mxu0 }
  0xfa   :  { %v515_v15 = vpop.f32.mrf.mxu1 }
  0xfb   :  { %v516_v48 = vadd.f32 %v515_v15, %v495_v14 }
  0xfd   :  { %v558_v18 = vsub.f32 %v516_v48, %v279_v6 }
  0xff   :  { %v560_v20 = vsub.f32 %v558_v18, %v365_v9 }
 0x101   :  { %v535_v49 = vpop.f32.mrf.mxu2  ;;  %v555_v16 = vpop.f32.mrf.mxu3  ;;  %v573_v44 = vmul.f32 40000.0, %v560_v20 }
 0x102   :  { %v556_v25 = vadd.f32 %v555_v16, %v535_v49 }
 0x104   :  { %v559_v19 = vsub.f32 %v556_v25, %v319_v3 }
 0x106   :  { %v561_v39 = vsub.f32 %v559_v19, %v405_v28 }
 0x108   :  { %v574_v40 = vmul.f32 40000.0, %v561_v39 }
 0x10a   :  { %v577_v47 = vrot.slane %v574_v40, 4 }
 0x10c   :  { %v578_v21 = vsel %vm569_vm12, %v573_v44, %v577_v47 }
 0x10d   :  { %580 = vst [vmem:[%s1716_s11] sm:$0xff] %v578_v21 }

</bundles_post_ra>
